<compile_context>
chip_gen: v6e
topology: v6e:2x2x1
jax: 0.10.0
libtpu: 0.0.40
codegen_flags: <defaults>
</compile_context>

<pallas_src>
import math

import jax
import jax.numpy as jnp
import numpy as np
from jax.experimental import pallas as pl
from jax.experimental.pallas import tpu as pltpu

# ---- module hyperparameters (from the PyTorch __init__) -------------------
EMBED_SIZE = 320
HEADS = 8
HEAD_DIM = EMBED_SIZE // HEADS          # 40
QUERY_DIM = 320
KV_DIM = 768

# ---- small example shapes ---------------------------------------------------
N = 2        # batch
LQ = 16      # query length
LK = 8       # key / value length


def _mha_kernel(q_ref, qk_ref, vout_ref, bo_ref, o_ref):
    """Fused cross-attention for one slab of query rows.

    q_ref    : (M, Dq)        bf16   flattened (batch_block * Lq) query rows
    qk_ref   : (H, Dq, Lk)    bf16   precomposed (scaled) Wq_h @ Kproj_h^T
    vout_ref : (H, Lk, E)     bf16   precomposed Vproj_h @ Wo_h
    bo_ref   : (1, E)         f32    fc_out bias
    o_ref    : (M, E)         f32
    """
    q = q_ref[...]                                        # (M, Dq) bf16
    m = q.shape[0]
    acc = jnp.zeros((m, EMBED_SIZE), dtype=jnp.float32)

    # Static unroll over heads (H=8). Each iteration is two MXU matmuls with
    # precomputed weights plus a tiny f32 softmax.
    for h in range(HEADS):
        # energy already includes the 1/sqrt(head_dim) scale (folded into QK).
        energy = jnp.dot(q, qk_ref[h], preferred_element_type=jnp.float32)   # (M, Lk)
        energy = energy - jnp.max(energy, axis=-1, keepdims=True)
        p = jnp.exp(energy)
        attn = p * pl.reciprocal(jnp.sum(p, axis=-1, keepdims=True), approx=True)
        acc = acc + jnp.dot(attn.astype(jnp.bfloat16), vout_ref[h],
                            preferred_element_type=jnp.float32)              # (M, E)

    o_ref[...] = acc + bo_ref[...]


def multi_head_cross_attention(queries, keys, values, Wq, Wk, Wv, Wo, bo,
                               *, batch_block=1):
    """Pallas implementation of MultiHeadCrossAttention.forward (mask=None),
    numerically equivalent to precompute()+fused_fwd()."""
    n, lq, dq = queries.shape
    lk = keys.shape[1]
    assert n % batch_block == 0, "batch must be divisible by batch_block"
    # TODO(synk): mask is None in the spec; attention masking is not implemented.

    scale = 1.0 / math.sqrt(HEAD_DIM)

    # ---- batch-shared precompute (plain JAX glue, == torch precompute()) ----
    keys2d = keys.reshape(lk, KV_DIM).astype(jnp.float32)
    values2d = values.reshape(lk, KV_DIM).astype(jnp.float32)

    kp = keys2d @ Wk.T                                    # (Lk, E)
    vp = values2d @ Wv.T                                  # (Lk, E)

    wq_heads = Wq.T.reshape(dq, HEADS, HEAD_DIM)          # (Dq, H, hd)
    kp_heads = kp.reshape(lk, HEADS, HEAD_DIM)            # (Lk, H, hd)
    vp_heads = vp.reshape(lk, HEADS, HEAD_DIM)            # (Lk, H, hd)
    wo_heads = Wo.T.reshape(HEADS, HEAD_DIM, EMBED_SIZE)  # (H, hd, E)

    # QK[h] = Wq_h @ Kproj_h^T, with the softmax scale folded in (review item).
    qk = jnp.einsum("dhc,khc->hdk", wq_heads, kp_heads) * scale   # (H, Dq, Lk)
    # Vout[h] = Vproj_h @ Wo_h  (folds the output projection, batch independent).
    vout = jnp.einsum("khc,hce->hke", vp_heads, wo_heads)         # (H, Lk, E)

    qk = qk.astype(jnp.bfloat16)
    vout = vout.astype(jnp.bfloat16)
    bias = bo.reshape(1, EMBED_SIZE).astype(jnp.float32)

    # Flatten N*Lq so each grid step feeds the MXU a taller row slab.
    q2d = queries.reshape(n * lq, dq).astype(jnp.bfloat16)
    block_rows = batch_block * lq
    grid = (n // batch_block,)

    grid_spec = pltpu.PrefetchScalarGridSpec(
        num_scalar_prefetch=0,
        grid=grid,
        in_specs=[
            pl.BlockSpec((block_rows, dq), lambda i: (i, 0)),                 # queries slab
            pl.BlockSpec((HEADS, dq, lk), lambda i: (0, 0, 0)),               # QK (shared)
            pl.BlockSpec((HEADS, lk, EMBED_SIZE), lambda i: (0, 0, 0)),       # Vout (shared)
            pl.BlockSpec((1, EMBED_SIZE), lambda i: (0, 0)),                  # bias
        ],
        out_specs=pl.BlockSpec((block_rows, EMBED_SIZE), lambda i: (i, 0)),
    )

    out2d = pl.pallas_call(
        _mha_kernel,
        out_shape=jax.ShapeDtypeStruct((n * lq, EMBED_SIZE), jnp.float32),
        grid_spec=grid_spec,
        compiler_params=pltpu.CompilerParams(
            dimension_semantics=("parallel",),        # keep >=2 grid steps so v7x uses both TCs
            vmem_limit_bytes=32 * 1024 * 1024,        # generous headroom, budget is <1 MB today
        ),
    )(q2d, qk, vout, bias)

    return out2d.reshape(n, lq, EMBED_SIZE)


def reference_forward(queries, keys, values, Wq, Wk, Wv, Wo, bo):
    """Pure-JAX f32 transliteration of the PyTorch forward() (mask=None)."""
    n, lq, _ = queries.shape
    lk = keys.shape[1]
    qp = queries @ Wq.T                                   # (N, Lq, E)
    kp = keys @ Wk.T                                      # (1, Lk, E)
    vp = values @ Wv.T                                    # (1, Lk, E)
    qp = qp.reshape(n, lq, HEADS, HEAD_DIM).transpose(0, 2, 1, 3)
    kp = jnp.broadcast_to(kp.reshape(1, lk, HEADS, HEAD_DIM), (n, lk, HEADS, HEAD_DIM)
                          ).transpose(0, 2, 1, 3)
    vp = jnp.broadcast_to(vp.reshape(1, lk, HEADS, HEAD_DIM), (n, lk, HEADS, HEAD_DIM)
                          ).transpose(0, 2, 1, 3)
    energy = jnp.einsum("nhqd,nhkd->nhqk", qp, kp)
    attn = jax.nn.softmax(energy / math.sqrt(HEAD_DIM), axis=-1)
    out = jnp.einsum("nhqk,nhkd->nhqd", attn, vp)
    out = out.transpose(0, 2, 1, 3).reshape(n, lq, EMBED_SIZE)
    return out @ Wo.T + bo


if __name__ == "__main__":
    key = jax.random.PRNGKey(0)
    kq, kk, kv, kwq, kwk, kwv, kwo, kbo = jax.random.split(key, 8)

    queries = jax.random.normal(kq, (N, LQ, QUERY_DIM), dtype=jnp.float32)
    keys = jax.random.normal(kk, (1, LK, KV_DIM), dtype=jnp.float32)
    values = jax.random.normal(kv, (1, LK, KV_DIM), dtype=jnp.float32)

    # deterministic synthetic parameters (torch nn.Linear weight shape = (out, in))
    Wq = jax.random.normal(kwq, (EMBED_SIZE, QUERY_DIM), dtype=jnp.float32) * 0.02
    Wk = jax.random.normal(kwk, (EMBED_SIZE, KV_DIM), dtype=jnp.float32) * 0.02
    Wv = jax.random.normal(kwv, (EMBED_SIZE, KV_DIM), dtype=jnp.float32) * 0.02
    Wo = jax.random.normal(kwo, (EMBED_SIZE, EMBED_SIZE), dtype=jnp.float32) * 0.02
    bo = jax.random.normal(kbo, (EMBED_SIZE,), dtype=jnp.float32) * 0.02

    out = multi_head_cross_attention(queries, keys, values, Wq, Wk, Wv, Wo, bo,
                                     batch_block=1)
    out = jax.block_until_ready(out)

    ref = reference_forward(queries, keys, values, Wq, Wk, Wv, Wo, bo)
    # bf16 MXU inputs (f32 softmax / accumulation) -> relaxed tolerance vs the f32 reference.
    np.testing.assert_allclose(np.asarray(out), np.asarray(ref), rtol=1e-2, atol=1e-2)

    print("KERNEL_OK")
</pallas_src>

<mosaic_0001>
module attributes {stable_mosaic.version = 11 : i64} {
  func.func @_mha_kernel(%arg0: i32, %arg1: memref<16x320xbf16, #tpu.memory_space<vmem>>, %arg2: memref<8x320x8xbf16, #tpu.memory_space<vmem>>, %arg3: memref<8x8x320xbf16, #tpu.memory_space<vmem>>, %arg4: memref<1x320xf32, #tpu.memory_space<vmem>>, %arg5: memref<16x320xf32, #tpu.memory_space<vmem>>) attributes {dimension_semantics = [#tpu.dimension_semantics<parallel>], iteration_bounds = array<i64: 2>, scalar_prefetch = 0 : i64, scratch_operands = 0 : i64, tpu.core_type = #tpu.core_type<tc>, window_params = [{transform_indices = @transform_0, window_bounds = array<i64: 16, 320>}, {pipeline_mode = #tpu.pipeline_mode<synchronous>, transform_indices = @transform_1, window_bounds = array<i64: 8, 320, 8>}, {pipeline_mode = #tpu.pipeline_mode<synchronous>, transform_indices = @transform_2, window_bounds = array<i64: 8, 8, 320>}, {pipeline_mode = #tpu.pipeline_mode<synchronous>, transform_indices = @transform_3, window_bounds = array<i64: 1, 320>}, {transform_indices = @transform_4, window_bounds = array<i64: 16, 320>}]} {
    %c0 = arith.constant 0 : index
    %c0_0 = arith.constant 0 : index
    %0 = vector.load %arg1[%c0, %c0_0] : memref<16x320xbf16, #tpu.memory_space<vmem>>, vector<16x320xbf16>
    %cst = arith.constant 0.000000e+00 : f32
    %1 = vector.broadcast %cst : f32 to vector<16x320xf32>
    %c0_1 = arith.constant 0 : index
    %c0_2 = arith.constant 0 : index
    %c0_3 = arith.constant 0 : index
    %2 = vector.load %arg2[%c0_1, %c0_2, %c0_3] : memref<8x320x8xbf16, #tpu.memory_space<vmem>>, vector<1x320x8xbf16>
    %3 = vector.shape_cast %2 : vector<1x320x8xbf16> to vector<320x8xbf16>
    %cst_4 = arith.constant dense<0.000000e+00> : vector<16x8xf32>
    %4 = tpu.matmul %0, %3, %cst_4 {dimension_numbers = #tpu.dot_dimension_numbers<[1], [0], [0], [1], [0, 0, 1, 1], [], []>} : vector<16x320xbf16>, vector<320x8xbf16>, vector<16x8xf32> -> vector<16x8xf32>
    %cst_5 = arith.constant dense<0xFF800000> : vector<16xf32>
    %5 = vector.multi_reduction <maximumf>, %4, %cst_5 [1] : vector<16x8xf32> to vector<16xf32>
    %6 = vector.shape_cast %5 : vector<16xf32> to vector<16x1xf32>
    %7 = vector.broadcast %6 : vector<16x1xf32> to vector<16x8xf32>
    %8 = arith.subf %4, %7 : vector<16x8xf32>
    %9 = math.exp %8 : vector<16x8xf32>
    %cst_6 = arith.constant dense<0.000000e+00> : vector<16xf32>
    %10 = vector.multi_reduction <add>, %9, %cst_6 [1] : vector<16x8xf32> to vector<16xf32>
    %11 = vector.shape_cast %10 : vector<16xf32> to vector<16x1xf32>
    %12 = tpu.reciprocal %11 {approx = true} : vector<16x1xf32> -> vector<16x1xf32>
    %13 = vector.broadcast %12 : vector<16x1xf32> to vector<16x8xf32>
    %14 = arith.mulf %9, %13 : vector<16x8xf32>
    %15 = arith.truncf %14 : vector<16x8xf32> to vector<16x8xbf16>
    %c0_7 = arith.constant 0 : index
    %c0_8 = arith.constant 0 : index
    %c0_9 = arith.constant 0 : index
    %16 = vector.load %arg3[%c0_7, %c0_8, %c0_9] : memref<8x8x320xbf16, #tpu.memory_space<vmem>>, vector<1x8x320xbf16>
    %17 = vector.shape_cast %16 : vector<1x8x320xbf16> to vector<8x320xbf16>
    %cst_10 = arith.constant dense<0.000000e+00> : vector<16x320xf32>
    %18 = tpu.matmul %15, %17, %cst_10 {dimension_numbers = #tpu.dot_dimension_numbers<[1], [0], [0], [1], [0, 0, 1, 1], [], []>} : vector<16x8xbf16>, vector<8x320xbf16>, vector<16x320xf32> -> vector<16x320xf32>
    %19 = arith.addf %1, %18 : vector<16x320xf32>
    %c1 = arith.constant 1 : index
    %c0_11 = arith.constant 0 : index
    %c0_12 = arith.constant 0 : index
    %20 = vector.load %arg2[%c1, %c0_11, %c0_12] : memref<8x320x8xbf16, #tpu.memory_space<vmem>>, vector<1x320x8xbf16>
    %21 = vector.shape_cast %20 : vector<1x320x8xbf16> to vector<320x8xbf16>
    %cst_13 = arith.constant dense<0.000000e+00> : vector<16x8xf32>
    %22 = tpu.matmul %0, %21, %cst_13 {dimension_numbers = #tpu.dot_dimension_numbers<[1], [0], [0], [1], [0, 0, 1, 1], [], []>} : vector<16x320xbf16>, vector<320x8xbf16>, vector<16x8xf32> -> vector<16x8xf32>
    %cst_14 = arith.constant dense<0xFF800000> : vector<16xf32>
    %23 = vector.multi_reduction <maximumf>, %22, %cst_14 [1] : vector<16x8xf32> to vector<16xf32>
    %24 = vector.shape_cast %23 : vector<16xf32> to vector<16x1xf32>
    %25 = vector.broadcast %24 : vector<16x1xf32> to vector<16x8xf32>
    %26 = arith.subf %22, %25 : vector<16x8xf32>
    %27 = math.exp %26 : vector<16x8xf32>
    %cst_15 = arith.constant dense<0.000000e+00> : vector<16xf32>
    %28 = vector.multi_reduction <add>, %27, %cst_15 [1] : vector<16x8xf32> to vector<16xf32>
    %29 = vector.shape_cast %28 : vector<16xf32> to vector<16x1xf32>
    %30 = tpu.reciprocal %29 {approx = true} : vector<16x1xf32> -> vector<16x1xf32>
    %31 = vector.broadcast %30 : vector<16x1xf32> to vector<16x8xf32>
    %32 = arith.mulf %27, %31 : vector<16x8xf32>
    %33 = arith.truncf %32 : vector<16x8xf32> to vector<16x8xbf16>
    %c1_16 = arith.constant 1 : index
    %c0_17 = arith.constant 0 : index
    %c0_18 = arith.constant 0 : index
    %34 = vector.load %arg3[%c1_16, %c0_17, %c0_18] : memref<8x8x320xbf16, #tpu.memory_space<vmem>>, vector<1x8x320xbf16>
    %35 = vector.shape_cast %34 : vector<1x8x320xbf16> to vector<8x320xbf16>
    %cst_19 = arith.constant dense<0.000000e+00> : vector<16x320xf32>
    %36 = tpu.matmul %33, %35, %cst_19 {dimension_numbers = #tpu.dot_dimension_numbers<[1], [0], [0], [1], [0, 0, 1, 1], [], []>} : vector<16x8xbf16>, vector<8x320xbf16>, vector<16x320xf32> -> vector<16x320xf32>
    %37 = arith.addf %19, %36 : vector<16x320xf32>
    %c2 = arith.constant 2 : index
    %c0_20 = arith.constant 0 : index
    %c0_21 = arith.constant 0 : index
    %38 = vector.load %arg2[%c2, %c0_20, %c0_21] : memref<8x320x8xbf16, #tpu.memory_space<vmem>>, vector<1x320x8xbf16>
    %39 = vector.shape_cast %38 : vector<1x320x8xbf16> to vector<320x8xbf16>
    %cst_22 = arith.constant dense<0.000000e+00> : vector<16x8xf32>
    %40 = tpu.matmul %0, %39, %cst_22 {dimension_numbers = #tpu.dot_dimension_numbers<[1], [0], [0], [1], [0, 0, 1, 1], [], []>} : vector<16x320xbf16>, vector<320x8xbf16>, vector<16x8xf32> -> vector<16x8xf32>
    %cst_23 = arith.constant dense<0xFF800000> : vector<16xf32>
    %41 = vector.multi_reduction <maximumf>, %40, %cst_23 [1] : vector<16x8xf32> to vector<16xf32>
    %42 = vector.shape_cast %41 : vector<16xf32> to vector<16x1xf32>
    %43 = vector.broadcast %42 : vector<16x1xf32> to vector<16x8xf32>
    %44 = arith.subf %40, %43 : vector<16x8xf32>
    %45 = math.exp %44 : vector<16x8xf32>
    %cst_24 = arith.constant dense<0.000000e+00> : vector<16xf32>
    %46 = vector.multi_reduction <add>, %45, %cst_24 [1] : vector<16x8xf32> to vector<16xf32>
    %47 = vector.shape_cast %46 : vector<16xf32> to vector<16x1xf32>
    %48 = tpu.reciprocal %47 {approx = true} : vector<16x1xf32> -> vector<16x1xf32>
    %49 = vector.broadcast %48 : vector<16x1xf32> to vector<16x8xf32>
    %50 = arith.mulf %45, %49 : vector<16x8xf32>
    %51 = arith.truncf %50 : vector<16x8xf32> to vector<16x8xbf16>
    %c2_25 = arith.constant 2 : index
    %c0_26 = arith.constant 0 : index
    %c0_27 = arith.constant 0 : index
    %52 = vector.load %arg3[%c2_25, %c0_26, %c0_27] : memref<8x8x320xbf16, #tpu.memory_space<vmem>>, vector<1x8x320xbf16>
    %53 = vector.shape_cast %52 : vector<1x8x320xbf16> to vector<8x320xbf16>
    %cst_28 = arith.constant dense<0.000000e+00> : vector<16x320xf32>
    %54 = tpu.matmul %51, %53, %cst_28 {dimension_numbers = #tpu.dot_dimension_numbers<[1], [0], [0], [1], [0, 0, 1, 1], [], []>} : vector<16x8xbf16>, vector<8x320xbf16>, vector<16x320xf32> -> vector<16x320xf32>
    %55 = arith.addf %37, %54 : vector<16x320xf32>
    %c3 = arith.constant 3 : index
    %c0_29 = arith.constant 0 : index
    %c0_30 = arith.constant 0 : index
    %56 = vector.load %arg2[%c3, %c0_29, %c0_30] : memref<8x320x8xbf16, #tpu.memory_space<vmem>>, vector<1x320x8xbf16>
    %57 = vector.shape_cast %56 : vector<1x320x8xbf16> to vector<320x8xbf16>
    %cst_31 = arith.constant dense<0.000000e+00> : vector<16x8xf32>
    %58 = tpu.matmul %0, %57, %cst_31 {dimension_numbers = #tpu.dot_dimension_numbers<[1], [0], [0], [1], [0, 0, 1, 1], [], []>} : vector<16x320xbf16>, vector<320x8xbf16>, vector<16x8xf32> -> vector<16x8xf32>
    %cst_32 = arith.constant dense<0xFF800000> : vector<16xf32>
    %59 = vector.multi_reduction <maximumf>, %58, %cst_32 [1] : vector<16x8xf32> to vector<16xf32>
    %60 = vector.shape_cast %59 : vector<16xf32> to vector<16x1xf32>
    %61 = vector.broadcast %60 : vector<16x1xf32> to vector<16x8xf32>
    %62 = arith.subf %58, %61 : vector<16x8xf32>
    %63 = math.exp %62 : vector<16x8xf32>
    %cst_33 = arith.constant dense<0.000000e+00> : vector<16xf32>
    %64 = vector.multi_reduction <add>, %63, %cst_33 [1] : vector<16x8xf32> to vector<16xf32>
    %65 = vector.shape_cast %64 : vector<16xf32> to vector<16x1xf32>
    %66 = tpu.reciprocal %65 {approx = true} : vector<16x1xf32> -> vector<16x1xf32>
    %67 = vector.broadcast %66 : vector<16x1xf32> to vector<16x8xf32>
    %68 = arith.mulf %63, %67 : vector<16x8xf32>
    %69 = arith.truncf %68 : vector<16x8xf32> to vector<16x8xbf16>
    %c3_34 = arith.constant 3 : index
    %c0_35 = arith.constant 0 : index
    %c0_36 = arith.constant 0 : index
    %70 = vector.load %arg3[%c3_34, %c0_35, %c0_36] : memref<8x8x320xbf16, #tpu.memory_space<vmem>>, vector<1x8x320xbf16>
    %71 = vector.shape_cast %70 : vector<1x8x320xbf16> to vector<8x320xbf16>
    %cst_37 = arith.constant dense<0.000000e+00> : vector<16x320xf32>
    %72 = tpu.matmul %69, %71, %cst_37 {dimension_numbers = #tpu.dot_dimension_numbers<[1], [0], [0], [1], [0, 0, 1, 1], [], []>} : vector<16x8xbf16>, vector<8x320xbf16>, vector<16x320xf32> -> vector<16x320xf32>
    %73 = arith.addf %55, %72 : vector<16x320xf32>
    %c4 = arith.constant 4 : index
    %c0_38 = arith.constant 0 : index
    %c0_39 = arith.constant 0 : index
    %74 = vector.load %arg2[%c4, %c0_38, %c0_39] : memref<8x320x8xbf16, #tpu.memory_space<vmem>>, vector<1x320x8xbf16>
    %75 = vector.shape_cast %74 : vector<1x320x8xbf16> to vector<320x8xbf16>
    %cst_40 = arith.constant dense<0.000000e+00> : vector<16x8xf32>
    %76 = tpu.matmul %0, %75, %cst_40 {dimension_numbers = #tpu.dot_dimension_numbers<[1], [0], [0], [1], [0, 0, 1, 1], [], []>} : vector<16x320xbf16>, vector<320x8xbf16>, vector<16x8xf32> -> vector<16x8xf32>
    %cst_41 = arith.constant dense<0xFF800000> : vector<16xf32>
    %77 = vector.multi_reduction <maximumf>, %76, %cst_41 [1] : vector<16x8xf32> to vector<16xf32>
    %78 = vector.shape_cast %77 : vector<16xf32> to vector<16x1xf32>
    %79 = vector.broadcast %78 : vector<16x1xf32> to vector<16x8xf32>
    %80 = arith.subf %76, %79 : vector<16x8xf32>
    %81 = math.exp %80 : vector<16x8xf32>
    %cst_42 = arith.constant dense<0.000000e+00> : vector<16xf32>
    %82 = vector.multi_reduction <add>, %81, %cst_42 [1] : vector<16x8xf32> to vector<16xf32>
    %83 = vector.shape_cast %82 : vector<16xf32> to vector<16x1xf32>
    %84 = tpu.reciprocal %83 {approx = true} : vector<16x1xf32> -> vector<16x1xf32>
    %85 = vector.broadcast %84 : vector<16x1xf32> to vector<16x8xf32>
    %86 = arith.mulf %81, %85 : vector<16x8xf32>
    %87 = arith.truncf %86 : vector<16x8xf32> to vector<16x8xbf16>
    %c4_43 = arith.constant 4 : index
    %c0_44 = arith.constant 0 : index
    %c0_45 = arith.constant 0 : index
    %88 = vector.load %arg3[%c4_43, %c0_44, %c0_45] : memref<8x8x320xbf16, #tpu.memory_space<vmem>>, vector<1x8x320xbf16>
    %89 = vector.shape_cast %88 : vector<1x8x320xbf16> to vector<8x320xbf16>
    %cst_46 = arith.constant dense<0.000000e+00> : vector<16x320xf32>
    %90 = tpu.matmul %87, %89, %cst_46 {dimension_numbers = #tpu.dot_dimension_numbers<[1], [0], [0], [1], [0, 0, 1, 1], [], []>} : vector<16x8xbf16>, vector<8x320xbf16>, vector<16x320xf32> -> vector<16x320xf32>
    %91 = arith.addf %73, %90 : vector<16x320xf32>
    %c5 = arith.constant 5 : index
    %c0_47 = arith.constant 0 : index
    %c0_48 = arith.constant 0 : index
    %92 = vector.load %arg2[%c5, %c0_47, %c0_48] : memref<8x320x8xbf16, #tpu.memory_space<vmem>>, vector<1x320x8xbf16>
    %93 = vector.shape_cast %92 : vector<1x320x8xbf16> to vector<320x8xbf16>
    %cst_49 = arith.constant dense<0.000000e+00> : vector<16x8xf32>
    %94 = tpu.matmul %0, %93, %cst_49 {dimension_numbers = #tpu.dot_dimension_numbers<[1], [0], [0], [1], [0, 0, 1, 1], [], []>} : vector<16x320xbf16>, vector<320x8xbf16>, vector<16x8xf32> -> vector<16x8xf32>
    %cst_50 = arith.constant dense<0xFF800000> : vector<16xf32>
    %95 = vector.multi_reduction <maximumf>, %94, %cst_50 [1] : vector<16x8xf32> to vector<16xf32>
    %96 = vector.shape_cast %95 : vector<16xf32> to vector<16x1xf32>
    %97 = vector.broadcast %96 : vector<16x1xf32> to vector<16x8xf32>
    %98 = arith.subf %94, %97 : vector<16x8xf32>
    %99 = math.exp %98 : vector<16x8xf32>
    %cst_51 = arith.constant dense<0.000000e+00> : vector<16xf32>
    %100 = vector.multi_reduction <add>, %99, %cst_51 [1] : vector<16x8xf32> to vector<16xf32>
    %101 = vector.shape_cast %100 : vector<16xf32> to vector<16x1xf32>
    %102 = tpu.reciprocal %101 {approx = true} : vector<16x1xf32> -> vector<16x1xf32>
    %103 = vector.broadcast %102 : vector<16x1xf32> to vector<16x8xf32>
    %104 = arith.mulf %99, %103 : vector<16x8xf32>
    %105 = arith.truncf %104 : vector<16x8xf32> to vector<16x8xbf16>
    %c5_52 = arith.constant 5 : index
    %c0_53 = arith.constant 0 : index
    %c0_54 = arith.constant 0 : index
    %106 = vector.load %arg3[%c5_52, %c0_53, %c0_54] : memref<8x8x320xbf16, #tpu.memory_space<vmem>>, vector<1x8x320xbf16>
    %107 = vector.shape_cast %106 : vector<1x8x320xbf16> to vector<8x320xbf16>
    %cst_55 = arith.constant dense<0.000000e+00> : vector<16x320xf32>
    %108 = tpu.matmul %105, %107, %cst_55 {dimension_numbers = #tpu.dot_dimension_numbers<[1], [0], [0], [1], [0, 0, 1, 1], [], []>} : vector<16x8xbf16>, vector<8x320xbf16>, vector<16x320xf32> -> vector<16x320xf32>
    %109 = arith.addf %91, %108 : vector<16x320xf32>
    %c6 = arith.constant 6 : index
    %c0_56 = arith.constant 0 : index
    %c0_57 = arith.constant 0 : index
    %110 = vector.load %arg2[%c6, %c0_56, %c0_57] : memref<8x320x8xbf16, #tpu.memory_space<vmem>>, vector<1x320x8xbf16>
    %111 = vector.shape_cast %110 : vector<1x320x8xbf16> to vector<320x8xbf16>
    %cst_58 = arith.constant dense<0.000000e+00> : vector<16x8xf32>
    %112 = tpu.matmul %0, %111, %cst_58 {dimension_numbers = #tpu.dot_dimension_numbers<[1], [0], [0], [1], [0, 0, 1, 1], [], []>} : vector<16x320xbf16>, vector<320x8xbf16>, vector<16x8xf32> -> vector<16x8xf32>
    %cst_59 = arith.constant dense<0xFF800000> : vector<16xf32>
    %113 = vector.multi_reduction <maximumf>, %112, %cst_59 [1] : vector<16x8xf32> to vector<16xf32>
    %114 = vector.shape_cast %113 : vector<16xf32> to vector<16x1xf32>
    %115 = vector.broadcast %114 : vector<16x1xf32> to vector<16x8xf32>
    %116 = arith.subf %112, %115 : vector<16x8xf32>
    %117 = math.exp %116 : vector<16x8xf32>
    %cst_60 = arith.constant dense<0.000000e+00> : vector<16xf32>
    %118 = vector.multi_reduction <add>, %117, %cst_60 [1] : vector<16x8xf32> to vector<16xf32>
    %119 = vector.shape_cast %118 : vector<16xf32> to vector<16x1xf32>
    %120 = tpu.reciprocal %119 {approx = true} : vector<16x1xf32> -> vector<16x1xf32>
    %121 = vector.broadcast %120 : vector<16x1xf32> to vector<16x8xf32>
    %122 = arith.mulf %117, %121 : vector<16x8xf32>
    %123 = arith.truncf %122 : vector<16x8xf32> to vector<16x8xbf16>
    %c6_61 = arith.constant 6 : index
    %c0_62 = arith.constant 0 : index
    %c0_63 = arith.constant 0 : index
    %124 = vector.load %arg3[%c6_61, %c0_62, %c0_63] : memref<8x8x320xbf16, #tpu.memory_space<vmem>>, vector<1x8x320xbf16>
    %125 = vector.shape_cast %124 : vector<1x8x320xbf16> to vector<8x320xbf16>
    %cst_64 = arith.constant dense<0.000000e+00> : vector<16x320xf32>
    %126 = tpu.matmul %123, %125, %cst_64 {dimension_numbers = #tpu.dot_dimension_numbers<[1], [0], [0], [1], [0, 0, 1, 1], [], []>} : vector<16x8xbf16>, vector<8x320xbf16>, vector<16x320xf32> -> vector<16x320xf32>
    %127 = arith.addf %109, %126 : vector<16x320xf32>
    %c7 = arith.constant 7 : index
    %c0_65 = arith.constant 0 : index
    %c0_66 = arith.constant 0 : index
    %128 = vector.load %arg2[%c7, %c0_65, %c0_66] : memref<8x320x8xbf16, #tpu.memory_space<vmem>>, vector<1x320x8xbf16>
    %129 = vector.shape_cast %128 : vector<1x320x8xbf16> to vector<320x8xbf16>
    %cst_67 = arith.constant dense<0.000000e+00> : vector<16x8xf32>
    %130 = tpu.matmul %0, %129, %cst_67 {dimension_numbers = #tpu.dot_dimension_numbers<[1], [0], [0], [1], [0, 0, 1, 1], [], []>} : vector<16x320xbf16>, vector<320x8xbf16>, vector<16x8xf32> -> vector<16x8xf32>
    %cst_68 = arith.constant dense<0xFF800000> : vector<16xf32>
    %131 = vector.multi_reduction <maximumf>, %130, %cst_68 [1] : vector<16x8xf32> to vector<16xf32>
    %132 = vector.shape_cast %131 : vector<16xf32> to vector<16x1xf32>
    %133 = vector.broadcast %132 : vector<16x1xf32> to vector<16x8xf32>
    %134 = arith.subf %130, %133 : vector<16x8xf32>
    %135 = math.exp %134 : vector<16x8xf32>
    %cst_69 = arith.constant dense<0.000000e+00> : vector<16xf32>
    %136 = vector.multi_reduction <add>, %135, %cst_69 [1] : vector<16x8xf32> to vector<16xf32>
    %137 = vector.shape_cast %136 : vector<16xf32> to vector<16x1xf32>
    %138 = tpu.reciprocal %137 {approx = true} : vector<16x1xf32> -> vector<16x1xf32>
    %139 = vector.broadcast %138 : vector<16x1xf32> to vector<16x8xf32>
    %140 = arith.mulf %135, %139 : vector<16x8xf32>
    %141 = arith.truncf %140 : vector<16x8xf32> to vector<16x8xbf16>
    %c7_70 = arith.constant 7 : index
    %c0_71 = arith.constant 0 : index
    %c0_72 = arith.constant 0 : index
    %142 = vector.load %arg3[%c7_70, %c0_71, %c0_72] : memref<8x8x320xbf16, #tpu.memory_space<vmem>>, vector<1x8x320xbf16>
    %143 = vector.shape_cast %142 : vector<1x8x320xbf16> to vector<8x320xbf16>
    %cst_73 = arith.constant dense<0.000000e+00> : vector<16x320xf32>
    %144 = tpu.matmul %141, %143, %cst_73 {dimension_numbers = #tpu.dot_dimension_numbers<[1], [0], [0], [1], [0, 0, 1, 1], [], []>} : vector<16x8xbf16>, vector<8x320xbf16>, vector<16x320xf32> -> vector<16x320xf32>
    %145 = arith.addf %127, %144 : vector<16x320xf32>
    %c0_74 = arith.constant 0 : index
    %c0_75 = arith.constant 0 : index
    %146 = vector.load %arg4[%c0_74, %c0_75] : memref<1x320xf32, #tpu.memory_space<vmem>>, vector<1x320xf32>
    %147 = vector.broadcast %146 : vector<1x320xf32> to vector<16x320xf32>
    %148 = arith.addf %145, %147 : vector<16x320xf32>
    %c0_76 = arith.constant 0 : index
    %c0_77 = arith.constant 0 : index
    %149 = vector.load %arg5[%c0_76, %c0_77] : memref<16x320xf32, #tpu.memory_space<vmem>>, vector<16x320xf32>
    tpu.vector_store %arg5[%c0_76, %c0_77], %148 {strides = array<i32>} : memref<16x320xf32, #tpu.memory_space<vmem>>, vector<16x320xf32>,
    return
  }
  func.func @transform_0(%arg0: i32) -> (i32, i32) {
    %c0_i32 = arith.constant 0 : i32
    %c0_i32_0 = arith.constant 0 : i32
    return %arg0, %c0_i32 : i32, i32
  }
  func.func @transform_1(%arg0: i32) -> (i32, i32, i32) {
    %c0_i32 = arith.constant 0 : i32
    %c0_i32_0 = arith.constant 0 : i32
    %c0_i32_1 = arith.constant 0 : i32
    %c0_i32_2 = arith.constant 0 : i32
    return %c0_i32, %c0_i32_0, %c0_i32_1 : i32, i32, i32
  }
  func.func @transform_2(%arg0: i32) -> (i32, i32, i32) {
    %c0_i32 = arith.constant 0 : i32
    %c0_i32_0 = arith.constant 0 : i32
    %c0_i32_1 = arith.constant 0 : i32
    %c0_i32_2 = arith.constant 0 : i32
    return %c0_i32, %c0_i32_0, %c0_i32_1 : i32, i32, i32
  }
  func.func @transform_3(%arg0: i32) -> (i32, i32) {
    %c0_i32 = arith.constant 0 : i32
    %c0_i32_0 = arith.constant 0 : i32
    %c0_i32_1 = arith.constant 0 : i32
    return %c0_i32, %c0_i32_0 : i32, i32
  }
  func.func @transform_4(%arg0: i32) -> (i32, i32) {
    %c0_i32 = arith.constant 0 : i32
    %c0_i32_0 = arith.constant 0 : i32
    return %arg0, %c0_i32 : i32, i32
  }
}

</mosaic_0001>

<bundles_post_ra>
// kernel: tpu_custom_call.1
= control target key start
LH: loop header
LB: loop body
LE: loop exit
PB: predicated region body
PF: predicated region fallthrough
CT: control target
= control target key end

     0   :  { %9 = vsyncpa [#allocation3], 0  ;;  %s5598_s0 = inlined_call_operand.vmem [shape: bf16[32,320], index: 0, kind: input, shape index: {}]   ;;  %s5599_s1 = inlined_call_operand.vmem [shape: bf16[8,320,8], index: 1, kind: input, shape index: {}]   ;;  %s5600_s2 = inlined_call_operand.vmem [shape: bf16[8,8,320], index: 2, kind: input, shape index: {}]   ;;  %s5601_s3 = inlined_call_operand.vmem [shape: f32[1,320], index: 3, kind: input, shape index: {}]   ;;  %s5602_s4 = inlined_call_operand.hbm [shape: f32[32,320], index: 4, kind: output, shape index: {}]  }
   0x1   :  { %11 = vsyncpa [#allocation3 + $0x1], 0  ;;  %s4648_s15 = smov 0   ;;  %s4650_s16 = smov 0  }
   0x2   :  { %s4652_s17 = smov 0   ;;  %s4654_s18 = smov 0  }
   0x3 LB: > { %s4669_s19 = sadd.s32 4294967295, %s4615_s18   ;;  %s3352_s20 = sadd.s32 4294967294, %s4615_s18   ;;  %s4615_s18 = sphi %s4654_s18, %s5608_s18   ;;  %s4611_s17 = sphi %s4652_s17, %s5607_s17   ;;  %s4607_s16 = sphi %s4650_s16, %s5606_s16   ;;  %s4603_s15 = sphi %s4648_s15, %s5605_s15  }
   0x4   : > { %s4673_s21 = sadd.s32 1, %s4615_s18   ;;  %s113_s22 = sadd.s32 1, %s4611_s17 }
   0x5   : > { %s110_s23 = ssub.s32 %s4615_s18, %s4673_s21  ;;  %p123_p0 = scmp.ne.s32.totalorder %s4611_s17, %s4607_s16 }
   0x6   : > { %p111_p1 = scmp.eq.s32.totalorder %s110_s23, 0  ;;  %p124_p2 = scmp.eq.s32.totalorder %s4669_s19, 1 }
   0x7   : > { %p129_p3 = scmp.ne.s32.totalorder %s4607_s16, %s4603_s15  ;;  %p130_p4 = scmp.eq.s32.totalorder %s3352_s20, 1 }
   0x8   : > { %s4684_s24 = scalar_select %p111_p1, %s4611_s17, %s113_s22  }
   0x9   : > { %p4686_p5 = por %p124_p2, %p123_p0  ;;  %p4690_p6 = por %p130_p4, %p129_p3 }
   0xa   : > { %p3355_p7 = scmp.ge.s32.totalorder %s4615_s18, 1  ;;  %p167_p8 = scmp.lt.s32.totalorder %s4615_s18, 3 }
   0xc   : > { %p168_p9 = pnand %p3355_p7, %p167_p8 }
   0xd   : > { %s3356_s7 = sshll.u32 (!%p168_p9), %s4669_s19, 1  ;;  %s191_s29 = sand.u32 (!%p168_p9), 1, %s4607_s16  }
   0xe   : > { %171 = sbr.rel (%p168_p9) target bundleno = 4050 (0xfd2), region = 36  ;;  %p195_p10 = scmp.lt.s32.totalorder (!%p168_p9), %s3356_s7, 3 }
   0xf   : > { %s4252_s6 = smul.u32 (!%p168_p9), 48, %s191_s29  ;;  %s4620_s20 = smov (!%p168_p9), [#allocation2]  }
  0x10   : > { %s4254_s10 = smul.u32 (!%p168_p9), 768, %s4669_s19  ;;  %s5558_s19 = scalar_lea.sflag (!%p168_p9), [#allocation3], %s191_s29 }
  0x11   : > { %s193_s8 = scalar_lea.vmem (!%p168_p9), [#allocation2], %s4252_s6  ;;  %s4559_s22 = sshll.u32 (!%p168_p9), %s4620_s20, 4  ;;  %s4560_s22 = int_to_ptr.vmem [resolvable:$false] %s4559_s22 }
  0x12   : > { %s3290_s11 = sshll.u32 (!%p168_p9), %s193_s8, 4  ;;  %s5553_s13 = scalar_lea.hbm (!%p168_p9), %s5602_s4, %s4254_s10  ;;  %s5548_s11 = int_to_ptr.vmem [resolvable:$true] %s3290_s11 }
  0x13   : > { %v4299_v0 = vld [vmem:[%s5599_s1 + $0x78] sm:$0xff]   ;;  %v4617_v1 = vmov 0.0   ;;  %vm4618_vm0 = vmmov 0   ;;  %v4302_v4 = vld [vmem:[%s5599_s1 + $0x70] sm:$0xff]   ;;  %s5610_s7 = smov (!%p195_p10, %s3356_s7), 3  ;;  %v4305_v7 = vld [vmem:[%s5599_s1 + $0x68] sm:$0xff]   ;;  %p4562_p0 = scmp.lt.s32.totalorder %s5548_s11, %s4560_s22 }
  0x14   : > { %4108 = vmatprep.subr.bf16.mxu1 %v4617_v1  ;;  %v4300_v2 = vld [vmem:[%s5599_s1 + $0x98] sm:$0xff]   ;;  %3876 = vmatprep.subr.bf16.mxu0 %v4299_v0  ;;  %v4303_v5 = vld [vmem:[%s5599_s1 + $0x90] sm:$0xff]   ;;  %v4306_v8 = vld [vmem:[%s5599_s1 + $0x88] sm:$0xff]   ;;  %s4253_s27 = smul.u32 12, %s5610_s7  ;;  %vm382_vm1 = vcmask 523264   ;;  %vm468_vm2 = vcmask 64512  }
  0x15   : > { %v4301_v3 = vld [vmem:[%s5599_s1 + $0x38] sm:$0xff]   ;;  %4116 = vmatprep.mubr.msk.bf16.mxu1 %vm4618_vm0, %v4617_v1  ;;  %4109 = vmatpush3.bf16.msra.mxu1 %v4300_v2  ;;  %v4304_v6 = vld [vmem:[%s5599_s1 + $0x30] sm:$0xff]   ;;  %v4307_v9 = vld [vmem:[%s5599_s1 + $0x28] sm:$0xff]   ;;  %vm774_vm3 = vcmask 1043456   ;;  %s4555_s14 = scalar_lea.vmem %s5548_s11, 768 }
  0x16   : > { %3877 = vmatpush3.bf16.msra.mxu0 %v4301_v3  ;;  %4110 = vmatprep.subr.bf16.mxu1 %v4617_v1  ;;  %v4308_v10 = vld [vmem:[%s5599_s1 + $0x60] sm:$0xff]   ;;  %s4735_s9 = scalar_lea.vmem %s5598_s0, %s4253_s27  ;;  %v4312_v14 = vld [vmem:[%s5599_s1 + $0x118] sm:$0xff]   ;;  %v4316_v18 = vld [vmem:[%s5599_s1 + $0x110] sm:$0xff]   ;;  %p4556_p11 = scmp.ne.s32.totalorder %s5548_s11, %s4555_s14 }
  0x17   : > { %3878 = vmatprep.subr.bf16.mxu0 %v4302_v4  ;;  %v4309_v11 = vld [vmem:[%s5599_s1 + $0x80] sm:$0xff]   ;;  %v4745_v13 = vld [vmem:[%s4735_s9 + $0x8] ss:$12 sps:$4 sm:$0xff]   ;;  %v4313_v15 = vld [vmem:[%s5599_s1 + $0x58] sm:$0xff]  }
  0x18   : > { %v4310_v12 = vld [vmem:[%s5599_s1 + $0x20] sm:$0xff]   ;;  %v4314_v16 = vld [vmem:[%s5599_s1 + $0xd8] sm:$0xff]   ;;  %v4317_v19 = vld [vmem:[%s5599_s1 + $0x50] sm:$0xff]   ;;  %p4557_p12 = pnand %p4556_p11, %p4686_p5 }
  0x19   : > { %4111 = vmatpush3.bf16.msra.mxu1 %v4303_v5  ;;  %v4315_v17 = vld [vmem:[%s5599_s1 + $0x18] sm:$0xff]   ;;  %v4318_v20 = vld [vmem:[%s5599_s1 + $0xd0] sm:$0xff]   ;;  %v4320_v22 = vld [vmem:[%s5599_s1 + $0x108] sm:$0xff]  }
  0x1a   : > { %3879 = vmatpush3.bf16.msra.mxu0 %v4304_v6  ;;  %4112 = vmatprep.subr.bf16.mxu1 %v4617_v1  ;;  %v4319_v21 = vld [vmem:[%s5599_s1 + $0x10] sm:$0xff]   ;;  %v4321_v23 = vld [vmem:[%s5599_s1 + $0x48] sm:$0xff]   ;;  %v4324_v26 = vld [vmem:[%s5599_s1 + $0x100] sm:$0xff]   ;;  %p4558_p13 = pneg %p4557_p12 }
  0x1b   : > { %3880 = vmatprep.subr.bf16.mxu0 %v4305_v7  ;;  %v4322_v24 = vld [vmem:[%s5599_s1 + $0xc8] sm:$0xff]   ;;  %v4325_v27 = vld [vmem:[%s5599_s1 + $0x40] sm:$0xff]   ;;  %v4330_v31 = vld [vmem:[%s5599_s1 + $0xf8] sm:$0xff]  }
  0x1c   : > { %v4323_v25 = vld [vmem:[%s5599_s1 + $0x8] sm:$0xff]   ;;  %v4326_v28 = vld [vmem:[%s5599_s1 + $0xc0] sm:$0xff]   ;;  %v4332_v33 = vld [vmem:[%s5599_s1 + $0xb8] sm:$0xff]  }
  0x1d   : > { %4113 = vmatpush3.bf16.msra.mxu1 %v4306_v8  ;;  %v4327_v29 = vld [vmem:[%s5599_s1] sm:$0xff]   ;;  %v4333_v34 = vld [vmem:[%s5599_s1 + $0x138] sm:$0xff]   ;;  %v4334_v35 = vld [vmem:[%s5599_s1 + $0xf0] sm:$0xff]  }
  0x1e   : > { %3881 = vmatpush3.bf16.msra.mxu0 %v4307_v9  ;;  %4114 = vmatprep.subr.bf16.mxu1 %v4617_v1  ;;  %v4798_v30 = vld [vmem:[%s4735_s9 + $0x4] ss:$12 sps:$4 sm:$0xff]   ;;  %v4805_v32 = vld [vmem:[%s4735_s9] ss:$12 sps:$4 sm:$0xff]  }
  0x1f   : > { %3882 = vmatprep.subr.bf16.mxu0 %v4308_v10  ;;  %418 = vmatprep.mubr.bf16.mxu0 %v4798_v30  ;;  %v4335_v36 = vld [vmem:[%s5599_s1 + $0xb0] sm:$0xff]   ;;  %v4337_v38 = vld [vmem:[%s5599_s1 + $0xe8] sm:$0xff]   ;;  %v4340_v41 = vld [vmem:[%s5599_s1 + $0xe0] sm:$0xff]  }
  0x20   : > { %v4336_v37 = vld [vmem:[%s5599_s1 + $0x130] sm:$0xff]   ;;  %v4338_v39 = vld [vmem:[%s5599_s1 + $0xa8] sm:$0xff]   ;;  %v4341_v42 = vld [vmem:[%s5599_s1 + $0xa0] sm:$0xff]  }
  0x21   : > { %4115 = vmatpush3.bf16.msra.mxu1 %v4309_v11  ;;  %v4339_v40 = vld [vmem:[%s5599_s1 + $0x128] sm:$0xff]   ;;  %v4342_v43 = vld [vmem:[%s5599_s1 + $0x120] sm:$0xff]  }
  0x22   : > { %3883 = vmatpush3.bf16.msra.mxu0 %v4310_v12  ;;  %3903 = vmatprep.subr.bf16.mxu1 %v4312_v14 }
  0x23   : > { %3884 = vmatprep.subr.bf16.mxu0 %v4313_v15 }
  0x24   : > { %4117 = vmatmul.mubr.msk.bf16.vlgmr.msra.gmra.mxu1 %vm382_vm1, %v4745_v13 }
  0x25   : > { %3904 = vmatpush3.bf16.msra.mxu1 %v4314_v16  ;;  %687 = vmatprep.mubr.bf16.mxu1 %v4798_v30 }
  0x26   : > { %3885 = vmatpush3.bf16.msra.mxu0 %v4315_v17  ;;  %3905 = vmatprep.subr.bf16.mxu1 %v4316_v18 }
  0x27   : > { %3886 = vmatprep.subr.bf16.mxu0 %v4317_v19 }
  0x29   : > { %3906 = vmatpush3.bf16.msra.mxu1 %v4318_v20 }
  0x2a   : > { %3887 = vmatpush3.bf16.msra.mxu0 %v4319_v21  ;;  %3907 = vmatprep.subr.bf16.mxu1 %v4320_v22 }
  0x2b   : > { %3888 = vmatprep.subr.bf16.mxu0 %v4321_v23 }
  0x2d   : > { %3908 = vmatpush3.bf16.msra.mxu1 %v4322_v24 }
  0x2e   : > { %3889 = vmatpush3.bf16.msra.mxu0 %v4323_v25  ;;  %3909 = vmatprep.subr.bf16.mxu1 %v4324_v26 }
  0x2f   : > { %3890 = vmatprep.subr.bf16.mxu0 %v4325_v27 }
  0x31   : > { %3910 = vmatpush3.bf16.msra.mxu1 %v4326_v28 }
  0x32   : > { %3891 = vmatpush3.bf16.msra.mxu0 %v4327_v29  ;;  %3911 = vmatprep.subr.bf16.mxu1 %v4330_v31  ;;  %v3443_v29 = vld [vmem:[%s5600_s2 + $0xc] sm:$0xff]  ;;  %v4345_v31 = vld [vmem:[%s5600_s2 + $0x14] ss:$0 sps:$4 sm:$0xff]  }
  0x33   : > { %4120 = vmatprep.subr.bf16.mxu0 %v4617_v1 }
  0x35   : > { %419 = vmatmul.mubr.bf16.vlgmr.msra.gmra.mxu0 %v4805_v32  ;;  %3912 = vmatpush3.bf16.msra.mxu1 %v4332_v33  ;;  %v492_v33 = vld [vmem:[%s5600_s2] sm:$0xff] }
  0x36   : > { %4121 = vmatpush3.bf16.msra.mxu0 %v4333_v34  ;;  %3913 = vmatprep.subr.bf16.mxu1 %v4334_v35  ;;  %v3446_v34 = vcombine.high %v3443_v29, %v3443_v29  ;;  %v3445_v35 = vcombine.low %v3443_v29, %v3443_v29 }
  0x37   : > { %4122 = vmatprep.subr.bf16.mxu0 %v4617_v1  ;;  %4128 = vmatprep.mubr.msk.bf16.mxu0 %vm4618_vm0, %v4617_v1 }
  0x39   : > { %3914 = vmatpush3.bf16.msra.mxu1 %v4335_v36  ;;  %v4619_v36 = vmov 0  }
  0x3a   : > { %4123 = vmatpush3.bf16.msra.mxu0 %v4336_v37  ;;  %3915 = vmatprep.subr.bf16.mxu1 %v4337_v38  ;;  %v3452_v37 = vcombine.high %v492_v33, %v492_v33  ;;  %v782_v38 = vsel %vm774_vm3, %v4345_v31, 0 }
  0x3b   : > { %4124 = vmatprep.subr.bf16.mxu0 %v4617_v1 }
  0x3d   : > { %3916 = vmatpush3.bf16.msra.mxu1 %v4338_v39  ;;  %v776_v39 = vsel %vm774_vm3, %v3445_v35, 0 }
  0x3e   : > { %4125 = vmatpush3.bf16.msra.mxu0 %v4339_v40  ;;  %3917 = vmatprep.subr.bf16.mxu1 %v4340_v41 }
  0x3f   : > { %4126 = vmatprep.subr.bf16.mxu0 %v4617_v1 }
  0x41   : > { %3918 = vmatpush3.bf16.msra.mxu1 %v4341_v42 }
  0x42   : > { %4127 = vmatpush3.bf16.msra.mxu0 %v4342_v43  ;;  %4132 = vmatprep.subr.bf16.mxu1 %v4617_v1 }
  0x43   : > { %3448 = vmatprep.subr.msk.bf16.mxu0 %vm774_vm3, %v3446_v34 }
  0x44   : > { %688 = vmatmul.mubr.bf16.vlgmr.msra.gmra.mxu1 %v4805_v32 }
  0x45   : > { %4129 = vmatmul.mubr.msk.bf16.vlgmr.msra.gmra.mxu0 %vm382_vm1, %v4745_v13  ;;  %4134 = vmatprep.mubr.msk.bf16.mxu1 %vm4618_vm0, %v4617_v1 }
  0x46   : > { %816 = vmatprep.mubr.bf16.mxu0 %v4619_v36  ;;  %4133 = vmatpush3.bf16.msra.mxu1 %v782_v38 }
  0x47   : > { %799 = vmatpush1.bf16.msra.mxu0 %v776_v39  ;;  %4138 = vmatprep.subr.bf16.mxu1 %v4617_v1 }
  0x48   : > { %3454 = vmatprep.subr.msk.bf16.mxu0 %vm774_vm3, %v3452_v37 }
  0xe4   : > { %v461_v44 = vpop.f32.mrf.mxu1 }
  0xe6   : > { %v4118_v45 = vpop.f32.mrf.mxu1 }
  0xe7   : > { %v3451_v45 = vcombine.low %v492_v33, %v492_v33 }
  0xe8   : > { %v464_v46 = vpop.f32.mrf.mxu1 }
  0xea   : > { %v4119_v47 = vpop.f32.mrf.mxu1 }
  0xf5   : > { %v3892_v48 = vpop.f32.mrf.mxu0 }
  0xf7   : > { %v3893_v49 = vpop.f32.mrf.mxu0 }
  0xf8   : > { %v3894_v50 = vadd.f32 %v3893_v49, %v3892_v48 }
  0xf9   : > { %v3895_v51 = vpop.f32.mrf.mxu0 }
  0xfa   : > { %v462_v52 = vadd.f32 %v3894_v50, %v461_v44 }
  0xfb   : > { %v3896_v53 = vpop.f32.mrf.mxu0 }
  0xfc   : > { %v3897_v54 = vadd.f32 %v3896_v53, %v3895_v51  ;;  %v469_v55 = vsel %vm468_vm2, %v462_v52, -inf  ;;  %v880_v51 = vsel %vm774_vm3, %v3451_v45, 0 }
  0xfd   : > { %470 = vmax.xlane.f32.xlu1 %v469_v55 }
  0xfe   : > { %v465_v56 = vadd.f32 %v3897_v54, %v464_v46  ;;  %v4348_v46 = vld [vmem:[%s5600_s2 + $0x8] ss:$0 sps:$4 sm:$0xff]   ;;  %v4349_v54 = vld [vmem:[%s5599_s1 + $0x1b8] sm:$0xff]  }
 0x100   : > { %v472_v57 = vsel %vm468_vm2, %v465_v56, -inf }
 0x101   : > { %473 = vmax.xlane.f32.xlu1 %v472_v57 }
 0x104   : > { %v3919_v58 = vpop.f32.mrf.mxu1 }
 0x105   : > { %v730_v59 = vpop.f32.mrf.mxu0 }
 0x106   : > { %v3920_v60 = vpop.f32.mrf.mxu1 }
 0x107   : > { %v3921_v61 = vadd.f32 %v3920_v60, %v3919_v58  ;;  %v4130_v62 = vpop.f32.mrf.mxu0  ;;  %v4350_v58 = vld [vmem:[%s5599_s1 + $0x178] sm:$0xff]  }
 0x108   : > { %v3922_v63 = vpop.f32.mrf.mxu1  ;;  %v4352_v62 = vld [vmem:[%s5599_s1 + $0x170] sm:$0xff]  }
 0x109   : > { %v733_v0 = vpop.f32.mrf.mxu0  ;;  %v731_v2 = vadd.f32 %v3921_v61, %v730_v59  ;;  %v4357_v59 = vld [vmem:[%s5599_s1 + $0x1d8] sm:$0xff]   ;;  %v4351_v61 = vld [vmem:[%s5599_s1 + $0x1b0] sm:$0xff]  }
 0x10a   : > { %v3923_v3 = vpop.f32.mrf.mxu1 }
 0x10b   : > { %v3924_v4 = vadd.f32 %v3923_v3, %v3922_v63  ;;  %v4131_v5 = vpop.f32.mrf.mxu0  ;;  %v737_v6 = vsel %vm468_vm2, %v731_v2, -inf  ;;  %v4360_v63 = vld [vmem:[%s5599_s1 + $0x1d0] sm:$0xff]   ;;  %v4363_v3 = vld [vmem:[%s5599_s1 + $0x1c8] sm:$0xff]  }
 0x10c   : > { %738 = vmax.xlane.f32.xlu0 %v737_v6  ;;  %v4356_v5 = vld [vmem:[%s5599_s1 + $0x160] sm:$0xff]  }
 0x10d   : > { %v734_v7 = vadd.f32 %v3924_v4, %v733_v0  ;;  %v4353_v0 = vld [vmem:[%s5599_s1 + $0x1a8] sm:$0xff]   ;;  %v4355_v4 = vld [vmem:[%s5599_s1 + $0x1a0] sm:$0xff]  }
 0x10e   : > { %v4366_v6 = vld [vmem:[%s5599_s1 + $0x1c0] sm:$0xff]  }
 0x10f   : > { %v740_v8 = vsel %vm468_vm2, %v734_v7, -inf }
 0x110   : > { %741 = vmax.xlane.f32.xlu0 %v740_v8  ;;  %v4359_v8 = vld [vmem:[%s5599_s1 + $0x158] sm:$0xff]  }
 0x186   : > { %v471_v9 = vpop.xlane.xlu1 %470 }
 0x187   : > { %v475_v10 = vsub.f32 %v462_v52, %v471_v9  ;;  %v886_v52 = vsel %vm774_vm3, %v4348_v46, 0  ;;  %v4361_v9 = vld [vmem:[%s5599_s1 + $0x190] sm:$0xff]  }
 0x189   : > { %v477_v14 = vmul.f32 1.442695, %v475_v10  ;;  %v4942_v10 = vld [vmem:[%s4735_s9 + $0x8] ss:$12 sps:$4 sm:$0xff]  }
 0x18a   : > { %v474_v11 = vpop.xlane.xlu1 %473 }
 0x18b   : > { %v476_v15 = vsub.f32 %v465_v56, %v474_v11  ;;  %v4362_v11 = vld [vmem:[%s5599_s1 + $0x150] sm:$0xff]  }
 0x18d   : > { %v479_v19 = vmul.f32 1.442695, %v476_v15  ;;  %v4368_v15 = vld [vmem:[%s5599_s1 + $0x140] sm:$0xff]  }
 0x195   : > { %v739_v12 = vpop.xlane.xlu0 %738 }
 0x196   : > { %v743_v13 = vsub.f32 %v731_v2, %v739_v12  ;;  %v4354_v2 = vld [vmem:[%s5599_s1 + $0x168] sm:$0xff]  }
 0x197   : > { %v4364_v12 = vld [vmem:[%s5599_s1 + $0x188] sm:$0xff]  }
 0x198   : > { %v745_v16 = vmul.f32 1.442695, %v743_v13  ;;  %v4365_v13 = vld [vmem:[%s5599_s1 + $0x148] sm:$0xff]  }
 0x199   : > { %v742_v17 = vpop.xlane.xlu0 %741 }
 0x19a   : > { %4487 = vpow2.f32 %v745_v16  ;;  %v744_v18 = vsub.f32 %v734_v7, %v742_v17  ;;  %v4358_v7 = vld [vmem:[%s5599_s1 + $0x198] sm:$0xff]  }
 0x19b   : > { %4489 = vpow2.f32 %v477_v14  ;;  %v4367_v14 = vld [vmem:[%s5599_s1 + $0x180] sm:$0xff]  }
 0x19c   : > { %v747_v20 = vmul.f32 1.442695, %v744_v18 }
 0x19e   : > { %4491 = vpow2.f32 %v747_v20 }
 0x19f   : > { %4493 = vpow2.f32 %v479_v19 }
 0x1a7   : > { %v4488_v21 = vpop.eup %4487 }
 0x1a8   : > { %v749_v22 = vsel %vm468_vm2, %v4488_v21, 0.0  ;;  %v4490_v23 = vpop.eup %4489 }
 0x1a9   : > { %750 = vadd.xlane.f32.xlu0 %v749_v22  ;;  %v481_v26 = vsel %vm468_vm2, %v4490_v23, 0.0 }
 0x1ab   : > { %v4492_v24 = vpop.eup %4491 }
 0x1ac   : > { %v752_v25 = vsel %vm468_vm2, %v4492_v24, 0.0  ;;  %v4494_v27 = vpop.eup %4493 }
 0x1ad   : > { %753 = vadd.xlane.f32.xlu1 %v752_v25  ;;  %482 = vadd.xlane.f32.xlu0 %v481_v26  ;;  %v484_v28 = vsel %vm468_vm2, %v4494_v27, 0.0 }
 0x1b1   : > { %485 = vadd.xlane.f32.xlu1 %v484_v28 }
 0x232   : > { %v751_v40 = vpop.xlane.xlu0 %750 }
 0x233   : > { %4495 = vrcp.f32 %v751_v40 }
 0x236   : > { %v754_v41 = vpop.xlane.xlu1 %753  ;;  %v483_v43 = vpop.xlane.xlu0 %482 }
 0x237   : > { %4497 = vrcp.f32 %v754_v41 }
 0x23a   : > { %v486_v42 = vpop.xlane.xlu1 %485 }
 0x23b   : > { %4499 = vrcp.f32 %v486_v42 }
 0x23c   : > { %4501 = vrcp.f32 %v483_v43 }
 0x240   : > { %v4496_v44 = vpop.eup %4495 }
 0x241   : > { %v757_v48 = vmul.f32 %v4496_v44, %v4488_v21 }
 0x244   : > { %v4498_v47 = vpop.eup %4497 }
 0x245   : > { %v758_v49 = vmul.f32 %v4498_v47, %v4492_v24 }
 0x247   : > { %v759_v50 = vpack.c.bf16 %v758_v49, %v757_v48 }
 0x248   : > { %v4500_v53 = vpop.eup %4499 }
 0x249   : > { %3449 = vmatmul.mubr.msk.bf16.vlgmr.msra.gmra.mxu0 %vm468_vm2, %v759_v50  ;;  %4135 = vmatmul.mubr.msk.bf16.vlgmr.msra.gmra.mxu1 %vm468_vm2, %v759_v50  ;;  %v4502_v55 = vpop.eup %4501  ;;  %v490_v56 = vmul.f32 %v4500_v53, %v4494_v27 }
 0x24a   : > { %903 = vmatpush1.bf16.msra.mxu0 %v880_v51  ;;  %4139 = vmatpush3.bf16.msra.mxu1 %v886_v52  ;;  %v489_v57 = vmul.f32 %v4502_v55, %v4490_v23 }
 0x24b   : > { %920 = vmatprep.mubr.bf16.mxu0 %v4619_v36  ;;  %4140 = vmatprep.mubr.msk.bf16.mxu1 %vm4618_vm0, %v4617_v1 }
 0x24c   : > { %3934 = vmatprep.subr.bf16.mxu0 %v4349_v54  ;;  %4144 = vmatprep.subr.bf16.mxu1 %v4617_v1  ;;  %v491_v60 = vpack.c.bf16 %v490_v56, %v489_v57 }
 0x251   : > { %3455 = vmatmul.mubr.msk.bf16.vlgmr.msra.gmra.mxu0 %vm468_vm2, %v491_v60  ;;  %4141 = vmatmul.mubr.msk.bf16.vlgmr.msra.gmra.mxu1 %vm468_vm2, %v491_v60 }
 0x252   : > { %3935 = vmatpush3.bf16.msra.mxu0 %v4350_v58  ;;  %4145 = vmatpush3.bf16.msra.mxu1 %v4357_v59 }
 0x253   : > { %3936 = vmatprep.subr.bf16.mxu0 %v4351_v61  ;;  %4146 = vmatprep.subr.bf16.mxu1 %v4617_v1 }
 0x254   : > { %4152 = vmatprep.mubr.msk.bf16.mxu1 %vm4618_vm0, %v4617_v1  ;;  %1165 = vmatprep.mubr.bf16.mxu0 %v4798_v30 }
 0x256   : > { %3937 = vmatpush3.bf16.msra.mxu0 %v4352_v62  ;;  %4147 = vmatpush3.bf16.msra.mxu1 %v4360_v63  ;;  %v4369_v63 = vld [vmem:[%s5599_s1 + $0x258] sm:$0xff]  }
 0x257   : > { %3938 = vmatprep.subr.bf16.mxu0 %v4353_v0  ;;  %4148 = vmatprep.subr.bf16.mxu1 %v4617_v1  ;;  %v4370_v0 = vld [vmem:[%s5599_s1 + $0x218] sm:$0xff]  }
 0x25a   : > { %3939 = vmatpush3.bf16.msra.mxu0 %v4354_v2  ;;  %4149 = vmatpush3.bf16.msra.mxu1 %v4363_v3  ;;  %v4371_v2 = vld [vmem:[%s5599_s1 + $0x250] sm:$0xff]  }
 0x25b   : > { %3940 = vmatprep.subr.bf16.mxu0 %v4355_v4  ;;  %4150 = vmatprep.subr.bf16.mxu1 %v4617_v1  ;;  %v4372_v3 = vld [vmem:[%s5599_s1 + $0x210] sm:$0xff]   ;;  %v4373_v4 = vld [vmem:[%s5599_s1 + $0x248] sm:$0xff]  }
 0x25e   : > { %3941 = vmatpush3.bf16.msra.mxu0 %v4356_v5  ;;  %4151 = vmatpush3.bf16.msra.mxu1 %v4366_v6  ;;  %v3518_v5 = vld [vmem:[%s5600_s2 + $0x18] sm:$0xff] }
 0x25f   : > { %3942 = vmatprep.subr.bf16.mxu0 %v4358_v7  ;;  %v3521_v6 = vcombine.high %v3518_v5, %v3518_v5  ;;  %v3520_v7 = vcombine.low %v3518_v5, %v3518_v5 }
 0x261   : > { %4153 = vmatmul.mubr.msk.bf16.vlgmr.msra.gmra.mxu1 %vm382_vm1, %v4942_v10  ;;  %3523 = vmatprep.subr.msk.bf16.mxu1 %vm774_vm3, %v3521_v6 }
 0x262   : > { %3943 = vmatpush3.bf16.msra.mxu0 %v4359_v8  ;;  %1293 = vmatprep.mubr.bf16.mxu1 %v4619_v36  ;;  %v4374_v8 = vld [vmem:[%s5599_s1 + $0x208] sm:$0xff]  }
 0x263   : > { %3944 = vmatprep.subr.bf16.mxu0 %v4361_v9  ;;  %v1253_v9 = vsel %vm774_vm3, %v3520_v7, 0 }
 0x264   : > { %1276 = vmatpush1.bf16.msra.mxu1 %v1253_v9 }
 0x265   : > { %4156 = vmatprep.subr.bf16.mxu1 %v4617_v1 }
 0x266   : > { %3945 = vmatpush3.bf16.msra.mxu0 %v4362_v11  ;;  %v4377_v11 = vld [vmem:[%s5599_s1 + $0x240] sm:$0xff]  }
 0x267   : > { %3946 = vmatprep.subr.bf16.mxu0 %v4364_v12  ;;  %v4378_v12 = vld [vmem:[%s5599_s1 + $0x200] sm:$0xff]  }
 0x26a   : > { %3947 = vmatpush3.bf16.msra.mxu0 %v4365_v13  ;;  %v4379_v13 = vld [vmem:[%s5599_s1 + $0x238] sm:$0xff]  }
 0x26b   : > { %3948 = vmatprep.subr.bf16.mxu0 %v4367_v14  ;;  %v4380_v14 = vld [vmem:[%s5599_s1 + $0x1f8] sm:$0xff]  }
 0x26e   : > { %3949 = vmatpush3.bf16.msra.mxu0 %v4368_v15  ;;  %v4382_v15 = vld [vmem:[%s5599_s1 + $0x230] sm:$0xff]  }
 0x26f   : > { %3963 = vmatprep.subr.bf16.mxu0 %v4369_v63 }
 0x271   : > { %1166 = vmatmul.mubr.bf16.vlgmr.msra.gmra.mxu0 %v4805_v32 }
 0x272   : > { %1544 = vmatprep.mubr.bf16.mxu0 %v4798_v30  ;;  %3964 = vmatpush3.bf16.msra.mxu0 %v4370_v0 }
 0x273   : > { %3965 = vmatprep.subr.bf16.mxu0 %v4371_v2 }
 0x276   : > { %3966 = vmatpush3.bf16.msra.mxu0 %v4372_v3 }
 0x277   : > { %3967 = vmatprep.subr.bf16.mxu0 %v4373_v4 }
 0x27a   : > { %3968 = vmatpush3.bf16.msra.mxu0 %v4374_v8 }
 0x27b   : > { %3969 = vmatprep.subr.bf16.mxu0 %v4377_v11 }
 0x27e   : > { %3970 = vmatpush3.bf16.msra.mxu0 %v4378_v12 }
 0x27f   : > { %3971 = vmatprep.subr.bf16.mxu0 %v4379_v13  ;;  %v4392_v13 = vld [vmem:[%s5599_s1 + $0x2f8] sm:$0xff]  }
 0x282   : > { %3972 = vmatpush3.bf16.msra.mxu0 %v4380_v14  ;;  %v4393_v14 = vld [vmem:[%s5599_s1 + $0x2b8] sm:$0xff]  }
 0x283   : > { %3973 = vmatprep.subr.bf16.mxu0 %v4382_v15  ;;  %v4394_v15 = vld [vmem:[%s5599_s1 + $0x2f0] sm:$0xff]  }
 0x309   : > { %v818_v16 = vpop.f32.mrf.mxu0  ;;  %v861_v17 = vpop.f32.mrf.mxu1 }
 0x30b   : > { %v820_v18 = vpop.f32.mrf.mxu0  ;;  %v4136_v19 = vpop.f32.mrf.mxu1 }
 0x30c   : > { %v4387_v19 = vld [vmem:[%s5599_s1 + $0x220] sm:$0xff]  }
 0x30d   : > { %v822_v20 = vpop.f32.mrf.mxu0  ;;  %v864_v21 = vpop.f32.mrf.mxu1 }
 0x30f   : > { %v824_v22 = vpop.f32.mrf.mxu0  ;;  %v4137_v23 = vpop.f32.mrf.mxu1 }
 0x311   : > { %v922_v24 = vpop.f32.mrf.mxu0  ;;  %v965_v25 = vpop.f32.mrf.mxu1 }
 0x312   : > { %v4964_v26 = vadd.f32 %v922_v24, %v818_v16  ;;  %v4966_v27 = vadd.f32 %v965_v25, %v861_v17  ;;  %v4383_v16 = vld [vmem:[%s5599_s1 + $0x1f0] sm:$0xff]   ;;  %v4384_v17 = vld [vmem:[%s5599_s1 + $0x228] sm:$0xff]  }
 0x313   : > { %v924_v28 = vpop.f32.mrf.mxu0  ;;  %v4142_v29 = vpop.f32.mrf.mxu1  ;;  %3974 = vmatpush3.bf16.msra.mxu0 %v4383_v16  ;;  %v4395_v16 = vld [vmem:[%s5599_s1 + $0x2b0] sm:$0xff]  }
 0x314   : > { %v4968_v31 = vadd.f32 %v924_v28, %v820_v18  ;;  %v4385_v18 = vld [vmem:[%s5599_s1 + $0x1e8] sm:$0xff]   ;;  %3975 = vmatprep.subr.bf16.mxu0 %v4384_v17  ;;  %v4381_v28 = vld [vmem:[%s5600_s2 + $0x20] ss:$0 sps:$4 sm:$0xff]  }
 0x315   : > { %v926_v32 = vpop.f32.mrf.mxu0  ;;  %v968_v30 = vpop.f32.mrf.mxu1  ;;  %v4396_v17 = vld [vmem:[%s5599_s1 + $0x2e8] sm:$0xff]  }
 0x316   : > { %v4970_v33 = vadd.f32 %v926_v32, %v822_v20  ;;  %v4972_v34 = vadd.f32 %v968_v30, %v864_v21  ;;  %v4388_v20 = vld [vmem:[%s5599_s1 + $0x1e0] sm:$0xff]  }
 0x317   : > { %v928_v35 = vpop.f32.mrf.mxu0  ;;  %v4143_v37 = vpop.f32.mrf.mxu1  ;;  %3976 = vmatpush3.bf16.msra.mxu0 %v4385_v18  ;;  %v5035_v21 = vld [vmem:[%s4735_s9] ss:$12 sps:$4 sm:$0xff]   ;;  %v3587_v18 = vld [vmem:[%s5600_s2 + $0x24] sm:$0xff] }
 0x318   : > { %v4974_v38 = vadd.f32 %v928_v35, %v824_v22  ;;  %3977 = vmatprep.subr.bf16.mxu0 %v4387_v19  ;;  %v5039_v22 = vld [vmem:[%s4735_s9 + $0x4] ss:$12 sps:$4 sm:$0xff]   ;;  %v1259_v37 = vsel %vm774_vm3, %v4381_v28, 0  ;;  %v3590_v19 = vcombine.high %v3587_v18, %v3587_v18 }
 0x319   : > { %v4401_v28 = vld [vmem:[%s5599_s1 + $0x2a0] sm:$0xff]  }
 0x31b   : > { %3978 = vmatpush3.bf16.msra.mxu0 %v4388_v20  ;;  %v3589_v20 = vcombine.low %v3587_v18, %v3587_v18 }
 0x31c   : > { %3992 = vmatprep.subr.bf16.mxu0 %v4392_v13 }
 0x31e   : > { %1545 = vmatmul.mubr.bf16.vlgmr.msra.gmra.mxu0 %v5035_v21 }
 0x31f   : > { %1923 = vmatprep.mubr.bf16.mxu0 %v5039_v22  ;;  %3993 = vmatpush3.bf16.msra.mxu0 %v4393_v14 }
 0x320   : > { %3994 = vmatprep.subr.bf16.mxu0 %v4394_v15 }
 0x321   : > { %v1208_v39 = vpop.f32.mrf.mxu1 }
 0x323   : > { %v4154_v40 = vpop.f32.mrf.mxu1  ;;  %3995 = vmatpush3.bf16.msra.mxu0 %v4395_v16 }
 0x324   : > { %v4389_v40 = vld [vmem:[%s5599_s1 + $0x270] sm:$0xff]   ;;  %3996 = vmatprep.subr.bf16.mxu0 %v4396_v17 }
 0x325   : > { %v1211_v41 = vpop.f32.mrf.mxu1 }
 0x327   : > { %v4155_v42 = vpop.f32.mrf.mxu1 }
 0x328   : > { %v4391_v42 = vld [vmem:[%s5599_s1 + $0x260] sm:$0xff]  }
 0x331   : > { %v3950_v43 = vpop.f32.mrf.mxu0 }
 0x333   : > { %v3951_v44 = vpop.f32.mrf.mxu0 }
 0x334   : > { %v3952_v45 = vadd.f32 %v3951_v44, %v3950_v43 }
 0x335   : > { %v3953_v46 = vpop.f32.mrf.mxu0 }
 0x336   : > { %v1209_v47 = vadd.f32 %v3952_v45, %v1208_v39  ;;  %v4386_v39 = vld [vmem:[%s5599_s1 + $0x278] sm:$0xff]  }
 0x337   : > { %v3954_v48 = vpop.f32.mrf.mxu0 }
 0x338   : > { %v3955_v49 = vadd.f32 %v3954_v48, %v3953_v46  ;;  %v1215_v50 = vsel %vm468_vm2, %v1209_v47, -inf }
 0x339   : > { %1216 = vmax.xlane.f32.xlu0 %v1215_v50 }
 0x33a   : > { %v1212_v51 = vadd.f32 %v3955_v49, %v1211_v41  ;;  %v4390_v41 = vld [vmem:[%s5599_s1 + $0x268] sm:$0xff]  }
 0x33c   : > { %v1218_v52 = vsel %vm468_vm2, %v1212_v51, -inf }
 0x33d   : > { %1219 = vmax.xlane.f32.xlu1 %v1218_v52 }
 0x3c2   : > { %v1217_v53 = vpop.xlane.xlu0 %1216 }
 0x3c3   : > { %v1221_v54 = vsub.f32 %v1209_v47, %v1217_v53 }
 0x3c5   : > { %v1223_v55 = vmul.f32 1.442695, %v1221_v54 }
 0x3c6   : > { %v1220_v56 = vpop.xlane.xlu1 %1219 }
 0x3c7   : > { %4503 = vpow2.f32 %v1223_v55  ;;  %v1222_v57 = vsub.f32 %v1212_v51, %v1220_v56 }
 0x3c9   : > { %v1225_v58 = vmul.f32 1.442695, %v1222_v57 }
 0x3cb   : > { %4505 = vpow2.f32 %v1225_v58 }
 0x3d4   : > { %v4504_v59 = vpop.eup %4503 }
 0x3d5   : > { %v1227_v60 = vsel %vm468_vm2, %v4504_v59, 0.0 }
 0x3d6   : > { %1228 = vadd.xlane.f32.xlu0 %v1227_v60 }
 0x3d8   : > { %v4506_v61 = vpop.eup %4505 }
 0x3d9   : > { %v1230_v62 = vsel %vm468_vm2, %v4506_v61, 0.0 }
 0x3da   : > { %1231 = vadd.xlane.f32.xlu1 %v1230_v62 }
 0x45f   : > { %v1229_v23 = vpop.xlane.xlu0 %1228 }
 0x460   : > { %4507 = vrcp.f32 %v1229_v23  ;;  %v4397_v23 = vld [vmem:[%s5599_s1 + $0x2a8] sm:$0xff]  }
 0x461   : > { %3997 = vmatpush3.bf16.msra.mxu0 %v4397_v23 }
 0x463   : > { %v1232_v24 = vpop.xlane.xlu1 %1231 }
 0x464   : > { %4509 = vrcp.f32 %v1232_v24  ;;  %v1632_v24 = vsel %vm774_vm3, %v3589_v20, 0 }
 0x46d   : > { %v4508_v25 = vpop.eup %4507 }
 0x46e   : > { %v1235_v32 = vmul.f32 %v4508_v25, %v4504_v59  ;;  %v4400_v25 = vld [vmem:[%s5599_s1 + $0x2e0] sm:$0xff]  }
 0x46f   : > { %3998 = vmatprep.subr.bf16.mxu0 %v4400_v25 }
 0x470   : > { %3999 = vmatpush3.bf16.msra.mxu0 %v4401_v28 }
 0x471   : > { %v4510_v29 = vpop.eup %4509 }
 0x472   : > { %v1236_v30 = vmul.f32 %v4510_v29, %v4506_v61  ;;  %v4402_v29 = vld [vmem:[%s5599_s1 + $0x2d8] sm:$0xff]  }
 0x473   : > { %4000 = vmatprep.subr.bf16.mxu0 %v4402_v29  ;;  %v4415_v29 = vld [vmem:[%s5599_s1 + $0x398] sm:$0xff]  }
 0x474   : > { %v1237_v35 = vpack.c.bf16 %v1236_v30, %v1235_v32  ;;  %v4403_v32 = vld [vmem:[%s5599_s1 + $0x298] sm:$0xff]   ;;  %v4405_v30 = vld [vmem:[%s5599_s1 + $0x2d0] sm:$0xff]  }
 0x475   : > { %4001 = vmatpush3.bf16.msra.mxu0 %v4403_v32  ;;  %v4416_v32 = vld [vmem:[%s5599_s1 + $0x358] sm:$0xff]  }
 0x476   : > { %3524 = vmatmul.mubr.msk.bf16.vlgmr.msra.gmra.mxu1 %vm468_vm2, %v1237_v35  ;;  %4002 = vmatprep.subr.bf16.mxu0 %v4405_v30  ;;  %v4417_v30 = vld [vmem:[%s5599_s1 + $0x390] sm:$0xff]  }
 0x477   : > { %4157 = vmatpush3.bf16.msra.mxu1 %v1259_v37  ;;  %4158 = vmatprep.mubr.msk.bf16.mxu1 %vm4618_vm0, %v4617_v1  ;;  %v4407_v37 = vld [vmem:[%s5599_s1 + $0x2c8] sm:$0xff]  }
 0x478   : > { %4162 = vmatprep.subr.bf16.mxu1 %v4617_v1 }
 0x47e   : > { %4159 = vmatmul.mubr.msk.bf16.vlgmr.msra.gmra.mxu1 %vm468_vm2, %v1237_v35  ;;  %v4406_v35 = vld [vmem:[%s5599_s1 + $0x290] sm:$0xff]  }
 0x47f   : > { %4163 = vmatpush3.bf16.msra.mxu1 %v4386_v39  ;;  %4170 = vmatprep.mubr.msk.bf16.mxu1 %vm4618_vm0, %v4617_v1  ;;  %v4408_v39 = vld [vmem:[%s5599_s1 + $0x288] sm:$0xff]  }
 0x480   : > { %4164 = vmatprep.subr.bf16.mxu1 %v4617_v1  ;;  %4003 = vmatpush3.bf16.msra.mxu0 %v4406_v35  ;;  %v4418_v35 = vld [vmem:[%s5599_s1 + $0x350] sm:$0xff]  }
 0x481   : > { %4004 = vmatprep.subr.bf16.mxu0 %v4407_v37  ;;  %v4419_v37 = vld [vmem:[%s5599_s1 + $0x388] sm:$0xff]  }
 0x483   : > { %4165 = vmatpush3.bf16.msra.mxu1 %v4389_v40  ;;  %v4410_v40 = vld [vmem:[%s5599_s1 + $0x2c0] sm:$0xff]  }
 0x484   : > { %4166 = vmatprep.subr.bf16.mxu1 %v4617_v1  ;;  %4005 = vmatpush3.bf16.msra.mxu0 %v4408_v39  ;;  %v3656_v39 = vld [vmem:[%s5600_s2 + $0x30] sm:$0xff] }
 0x485   : > { %4006 = vmatprep.subr.bf16.mxu0 %v4410_v40  ;;  %v3659_v40 = vcombine.high %v3656_v39, %v3656_v39 }
 0x487   : > { %4167 = vmatpush3.bf16.msra.mxu1 %v4390_v41  ;;  %v4411_v41 = vld [vmem:[%s5599_s1 + $0x280] sm:$0xff]  }
 0x488   : > { %4168 = vmatprep.subr.bf16.mxu1 %v4617_v1  ;;  %4007 = vmatpush3.bf16.msra.mxu0 %v4411_v41  ;;  %v3658_v41 = vcombine.low %v3656_v39, %v3656_v39 }
 0x489   : > { %4021 = vmatprep.subr.bf16.mxu0 %v4415_v29 }
 0x48b   : > { %4169 = vmatpush3.bf16.msra.mxu1 %v4391_v42  ;;  %1924 = vmatmul.mubr.bf16.vlgmr.msra.gmra.mxu0 %v5035_v21 }
 0x48c   : > { %3592 = vmatprep.subr.msk.bf16.mxu1 %vm774_vm3, %v3590_v19  ;;  %2302 = vmatprep.mubr.bf16.mxu0 %v5039_v22 }
 0x48d   : > { %4022 = vmatpush3.bf16.msra.mxu0 %v4416_v32 }
 0x48e   : > { %4171 = vmatmul.mubr.msk.bf16.vlgmr.msra.gmra.mxu1 %vm382_vm1, %v4942_v10  ;;  %4023 = vmatprep.subr.bf16.mxu0 %v4417_v30 }
 0x48f   : > { %1672 = vmatprep.mubr.bf16.mxu1 %v4619_v36  ;;  %1655 = vmatpush1.bf16.msra.mxu1 %v1632_v24 }
 0x490   : > { %4174 = vmatprep.subr.bf16.mxu1 %v4617_v1 }
 0x491   : > { %4024 = vmatpush3.bf16.msra.mxu0 %v4418_v35 }
 0x492   : > { %4025 = vmatprep.subr.bf16.mxu0 %v4419_v37 }
 0x536   : > { %v1295_v43 = vpop.f32.mrf.mxu1 }
 0x537   : > { %v5072_v44 = vadd.f32 %v1295_v43, %v4964_v26  ;;  %v3979_v26 = vpop.f32.mrf.mxu0 }
 0x538   : > { %v1297_v45 = vpop.f32.mrf.mxu1 }
 0x539   : > { %v5075_v46 = vadd.f32 %v1297_v45, %v4968_v31  ;;  %v3980_v56 = vpop.f32.mrf.mxu0 }
 0x53a   : > { %v1299_v47 = vpop.f32.mrf.mxu1  ;;  %v3981_v58 = vadd.f32 %v3980_v56, %v3979_v26  ;;  %v4412_v56 = vld [vmem:[%s5599_s1 + $0x310] sm:$0xff]  }
 0x53b   : > { %v5078_v48 = vadd.f32 %v1299_v47, %v4970_v33  ;;  %v3982_v57 = vpop.f32.mrf.mxu0  ;;  %v4404_v47 = vld [vmem:[%s5600_s2 + $0x2c] ss:$0 sps:$4 sm:$0xff]  }
 0x53c   : > { %v1301_v49 = vpop.f32.mrf.mxu1  ;;  %v1638_v26 = vsel %vm774_vm3, %v4404_v47, 0  ;;  %v4424_v47 = vld [vmem:[%s5599_s1 + $0x340] sm:$0xff]  }
 0x53d   : > { %v5081_v50 = vadd.f32 %v1301_v49, %v4974_v38  ;;  %v3983_v33 = vpop.f32.mrf.mxu0 }
 0x53e   : > { %v1338_v51 = vpop.f32.mrf.mxu1  ;;  %v3984_v38 = vadd.f32 %v3983_v33, %v3982_v57  ;;  %v4413_v57 = vld [vmem:[%s5599_s1 + $0x308] sm:$0xff]  }
 0x53f   : > { %v5084_v52 = vadd.f32 %v1338_v51, %v4966_v27 }
 0x540   : > { %v4160_v53 = vpop.f32.mrf.mxu1 }
 0x542   : > { %v1341_v54 = vpop.f32.mrf.mxu1 }
 0x543   : > { %v5087_v55 = vadd.f32 %v1341_v54, %v4972_v34 }
 0x544   : > { %v4161_v31 = vpop.f32.mrf.mxu1 }
 0x545   : > { %v4409_v31 = vld [vmem:[%s5599_s1 + $0x318] sm:$0xff]  }
 0x54e   : > { %v1587_v59 = vpop.f32.mrf.mxu1 }
 0x54f   : > { %v1588_v60 = vadd.f32 %v3981_v58, %v1587_v59  ;;  %v4414_v58 = vld [vmem:[%s5599_s1 + $0x300] sm:$0xff]  }
 0x550   : > { %v4172_v61 = vpop.f32.mrf.mxu1 }
 0x551   : > { %v1594_v62 = vsel %vm468_vm2, %v1588_v60, -inf }
 0x552   : > { %1595 = vmax.xlane.f32.xlu0 %v1594_v62  ;;  %v1590_v27 = vpop.f32.mrf.mxu1 }
 0x553   : > { %v1591_v63 = vadd.f32 %v3984_v38, %v1590_v27 }
 0x554   : > { %v4173_v0 = vpop.f32.mrf.mxu1 }
 0x555   : > { %v1597_v2 = vsel %vm468_vm2, %v1591_v63, -inf }
 0x556   : > { %1598 = vmax.xlane.f32.xlu1 %v1597_v2 }
 0x5db   : > { %v1596_v34 = vpop.xlane.xlu0 %1595 }
 0x5dc   : > { %v1600_v3 = vsub.f32 %v1588_v60, %v1596_v34 }
 0x5de   : > { %v1602_v4 = vmul.f32 1.442695, %v1600_v3 }
 0x5df   : > { %v1599_v5 = vpop.xlane.xlu1 %1598 }
 0x5e0   : > { %4511 = vpow2.f32 %v1602_v4  ;;  %v1601_v6 = vsub.f32 %v1591_v63, %v1599_v5 }
 0x5e2   : > { %v1604_v7 = vmul.f32 1.442695, %v1601_v6 }
 0x5e4   : > { %4513 = vpow2.f32 %v1604_v7 }
 0x5ed   : > { %v4512_v8 = vpop.eup %4511 }
 0x5ee   : > { %v1606_v9 = vsel %vm468_vm2, %v4512_v8, 0.0 }
 0x5ef   : > { %1607 = vadd.xlane.f32.xlu0 %v1606_v9 }
 0x5f1   : > { %v4514_v11 = vpop.eup %4513 }
 0x5f2   : > { %v1609_v12 = vsel %vm468_vm2, %v4514_v11, 0.0 }
 0x5f3   : > { %1610 = vadd.xlane.f32.xlu1 %v1609_v12 }
 0x678   : > { %v1608_v42 = vpop.xlane.xlu0 %1607 }
 0x679   : > { %4515 = vrcp.f32 %v1608_v42  ;;  %v4420_v42 = vld [vmem:[%s5599_s1 + $0x348] sm:$0xff]  }
 0x67a   : > { %4026 = vmatpush3.bf16.msra.mxu0 %v4420_v42 }
 0x67c   : > { %v1611_v43 = vpop.xlane.xlu1 %1610 }
 0x67d   : > { %4517 = vrcp.f32 %v1611_v43  ;;  %v2011_v43 = vsel %vm774_vm3, %v3658_v41, 0 }
 0x686   : > { %v4516_v45 = vpop.eup %4515 }
 0x687   : > { %v1614_v51 = vmul.f32 %v4516_v45, %v4512_v8  ;;  %v4423_v45 = vld [vmem:[%s5599_s1 + $0x380] sm:$0xff]  }
 0x688   : > { %4027 = vmatprep.subr.bf16.mxu0 %v4423_v45 }
 0x689   : > { %4028 = vmatpush3.bf16.msra.mxu0 %v4424_v47 }
 0x68a   : > { %v4518_v49 = vpop.eup %4517 }
 0x68b   : > { %v1615_v53 = vmul.f32 %v4518_v49, %v4514_v11  ;;  %v4425_v49 = vld [vmem:[%s5599_s1 + $0x378] sm:$0xff]  }
 0x68c   : > { %4029 = vmatprep.subr.bf16.mxu0 %v4425_v49  ;;  %v4438_v49 = vld [vmem:[%s5599_s1 + $0x438] sm:$0xff]  }
 0x68d   : > { %v1616_v54 = vpack.c.bf16 %v1615_v53, %v1614_v51  ;;  %v4426_v51 = vld [vmem:[%s5599_s1 + $0x338] sm:$0xff]   ;;  %v4428_v53 = vld [vmem:[%s5599_s1 + $0x370] sm:$0xff]  }
 0x68e   : > { %4030 = vmatpush3.bf16.msra.mxu0 %v4426_v51  ;;  %v4439_v51 = vld [vmem:[%s5599_s1 + $0x3f8] sm:$0xff]  }
 0x68f   : > { %3593 = vmatmul.mubr.msk.bf16.vlgmr.msra.gmra.mxu1 %vm468_vm2, %v1616_v54  ;;  %4031 = vmatprep.subr.bf16.mxu0 %v4428_v53  ;;  %v4440_v53 = vld [vmem:[%s5599_s1 + $0x430] sm:$0xff]  }
 0x690   : > { %4175 = vmatpush3.bf16.msra.mxu1 %v1638_v26  ;;  %4176 = vmatprep.mubr.msk.bf16.mxu1 %vm4618_vm0, %v4617_v1  ;;  %v4430_v26 = vld [vmem:[%s5599_s1 + $0x368] sm:$0xff]  }
 0x691   : > { %4180 = vmatprep.subr.bf16.mxu1 %v4617_v1 }
 0x697   : > { %4177 = vmatmul.mubr.msk.bf16.vlgmr.msra.gmra.mxu1 %vm468_vm2, %v1616_v54  ;;  %v4429_v54 = vld [vmem:[%s5599_s1 + $0x330] sm:$0xff]  }
 0x698   : > { %4181 = vmatpush3.bf16.msra.mxu1 %v4409_v31  ;;  %4188 = vmatprep.mubr.msk.bf16.mxu1 %vm4618_vm0, %v4617_v1  ;;  %v4431_v31 = vld [vmem:[%s5599_s1 + $0x328] sm:$0xff]  }
 0x699   : > { %4182 = vmatprep.subr.bf16.mxu1 %v4617_v1  ;;  %4032 = vmatpush3.bf16.msra.mxu0 %v4429_v54  ;;  %v4441_v54 = vld [vmem:[%s5599_s1 + $0x3f0] sm:$0xff]  }
 0x69a   : > { %4033 = vmatprep.subr.bf16.mxu0 %v4430_v26  ;;  %v4442_v26 = vld [vmem:[%s5599_s1 + $0x428] sm:$0xff]  }
 0x69c   : > { %4183 = vmatpush3.bf16.msra.mxu1 %v4412_v56  ;;  %v4433_v56 = vld [vmem:[%s5599_s1 + $0x360] sm:$0xff]  }
 0x69d   : > { %4184 = vmatprep.subr.bf16.mxu1 %v4617_v1  ;;  %4034 = vmatpush3.bf16.msra.mxu0 %v4431_v31  ;;  %v3725_v31 = vld [vmem:[%s5600_s2 + $0x3c] sm:$0xff] }
 0x69e   : > { %4035 = vmatprep.subr.bf16.mxu0 %v4433_v56  ;;  %v3728_v56 = vcombine.high %v3725_v31, %v3725_v31 }
 0x6a0   : > { %4185 = vmatpush3.bf16.msra.mxu1 %v4413_v57  ;;  %v4434_v57 = vld [vmem:[%s5599_s1 + $0x320] sm:$0xff]  }
 0x6a1   : > { %4186 = vmatprep.subr.bf16.mxu1 %v4617_v1  ;;  %4036 = vmatpush3.bf16.msra.mxu0 %v4434_v57  ;;  %v3727_v57 = vcombine.low %v3725_v31, %v3725_v31 }
 0x6a2   : > { %4050 = vmatprep.subr.bf16.mxu0 %v4438_v49 }
 0x6a4   : > { %4187 = vmatpush3.bf16.msra.mxu1 %v4414_v58  ;;  %2303 = vmatmul.mubr.bf16.vlgmr.msra.gmra.mxu0 %v5035_v21 }
 0x6a5   : > { %3661 = vmatprep.subr.msk.bf16.mxu1 %vm774_vm3, %v3659_v40  ;;  %2681 = vmatprep.mubr.bf16.mxu0 %v5039_v22 }
 0x6a6   : > { %4051 = vmatpush3.bf16.msra.mxu0 %v4439_v51 }
 0x6a7   : > { %4189 = vmatmul.mubr.msk.bf16.vlgmr.msra.gmra.mxu1 %vm382_vm1, %v4942_v10  ;;  %4052 = vmatprep.subr.bf16.mxu0 %v4440_v53 }
 0x6a8   : > { %2051 = vmatprep.mubr.bf16.mxu1 %v4619_v36  ;;  %2034 = vmatpush1.bf16.msra.mxu1 %v2011_v43 }
 0x6a9   : > { %4192 = vmatprep.subr.bf16.mxu1 %v4617_v1 }
 0x6aa   : > { %4053 = vmatpush3.bf16.msra.mxu0 %v4441_v54 }
 0x6ab   : > { %4054 = vmatprep.subr.bf16.mxu0 %v4442_v26 }
 0x74f   : > { %v1674_v33 = vpop.f32.mrf.mxu1 }
 0x750   : > { %v5179_v59 = vadd.f32 %v1674_v33, %v5072_v44  ;;  %v4008_v44 = vpop.f32.mrf.mxu0 }
 0x751   : > { %v1676_v60 = vpop.f32.mrf.mxu1 }
 0x752   : > { %v5182_v61 = vadd.f32 %v1676_v60, %v5075_v46  ;;  %v4009_v5 = vpop.f32.mrf.mxu0 }
 0x753   : > { %v1678_v38 = vpop.f32.mrf.mxu1  ;;  %v4010_v7 = vadd.f32 %v4009_v5, %v4008_v44  ;;  %v4435_v5 = vld [vmem:[%s5599_s1 + $0x3b0] sm:$0xff]  }
 0x754   : > { %v5185_v62 = vadd.f32 %v1678_v38, %v5078_v48  ;;  %v4011_v6 = vpop.f32.mrf.mxu0  ;;  %v4427_v38 = vld [vmem:[%s5600_s2 + $0x38] ss:$0 sps:$4 sm:$0xff]  }
 0x755   : > { %v1680_v27 = vpop.f32.mrf.mxu1  ;;  %v2017_v44 = vsel %vm774_vm3, %v4427_v38, 0  ;;  %v4447_v38 = vld [vmem:[%s5599_s1 + $0x3e0] sm:$0xff]  }
 0x756   : > { %v5188_v63 = vadd.f32 %v1680_v27, %v5081_v50  ;;  %v4012_v48 = vpop.f32.mrf.mxu0 }
 0x757   : > { %v1717_v0 = vpop.f32.mrf.mxu1  ;;  %v4013_v50 = vadd.f32 %v4012_v48, %v4011_v6  ;;  %v4436_v6 = vld [vmem:[%s5599_s1 + $0x3a8] sm:$0xff]  }
 0x758   : > { %v5191_v2 = vadd.f32 %v1717_v0, %v5084_v52 }
 0x759   : > { %v4178_v34 = vpop.f32.mrf.mxu1 }
 0x75b   : > { %v1720_v3 = vpop.f32.mrf.mxu1 }
 0x75c   : > { %v5194_v4 = vadd.f32 %v1720_v3, %v5087_v55 }
 0x75d   : > { %v4179_v46 = vpop.f32.mrf.mxu1 }
 0x75e   : > { %v4432_v46 = vld [vmem:[%s5599_s1 + $0x3b8] sm:$0xff]  }
 0x767   : > { %v1966_v8 = vpop.f32.mrf.mxu1 }
 0x768   : > { %v1967_v9 = vadd.f32 %v4010_v7, %v1966_v8  ;;  %v4437_v7 = vld [vmem:[%s5599_s1 + $0x3a0] sm:$0xff]  }
 0x769   : > { %v4190_v11 = vpop.f32.mrf.mxu1 }
 0x76a   : > { %v1973_v12 = vsel %vm468_vm2, %v1967_v9, -inf }
 0x76b   : > { %1974 = vmax.xlane.f32.xlu0 %v1973_v12  ;;  %v1969_v52 = vpop.f32.mrf.mxu1 }
 0x76c   : > { %v1970_v13 = vadd.f32 %v4013_v50, %v1969_v52 }
 0x76d   : > { %v4191_v14 = vpop.f32.mrf.mxu1 }
 0x76e   : > { %v1976_v15 = vsel %vm468_vm2, %v1970_v13, -inf }
 0x76f   : > { %1977 = vmax.xlane.f32.xlu1 %v1976_v15 }
 0x7f4   : > { %v1975_v55 = vpop.xlane.xlu0 %1974 }
 0x7f5   : > { %v1979_v16 = vsub.f32 %v1967_v9, %v1975_v55 }
 0x7f7   : > { %v1981_v17 = vmul.f32 1.442695, %v1979_v16 }
 0x7f8   : > { %v1978_v18 = vpop.xlane.xlu1 %1977 }
 0x7f9   : > { %4519 = vpow2.f32 %v1981_v17  ;;  %v1980_v19 = vsub.f32 %v1970_v13, %v1978_v18 }
 0x7fb   : > { %v1983_v20 = vmul.f32 1.442695, %v1980_v19 }
 0x7fd   : > { %4521 = vpow2.f32 %v1983_v20 }
 0x806   : > { %v4520_v23 = vpop.eup %4519 }
 0x807   : > { %v1985_v24 = vsel %vm468_vm2, %v4520_v23, 0.0 }
 0x808   : > { %1986 = vadd.xlane.f32.xlu0 %v1985_v24 }
 0x80a   : > { %v4522_v25 = vpop.eup %4521 }
 0x80b   : > { %v1988_v28 = vsel %vm468_vm2, %v4522_v25, 0.0 }
 0x80c   : > { %1989 = vadd.xlane.f32.xlu1 %v1988_v28 }
 0x891   : > { %v1987_v58 = vpop.xlane.xlu0 %1986 }
 0x892   : > { %4523 = vrcp.f32 %v1987_v58  ;;  %v4443_v58 = vld [vmem:[%s5599_s1 + $0x3e8] sm:$0xff]  }
 0x893   : > { %4055 = vmatpush3.bf16.msra.mxu0 %v4443_v58 }
 0x895   : > { %v1990_v33 = vpop.xlane.xlu1 %1989 }
 0x896   : > { %4525 = vrcp.f32 %v1990_v33  ;;  %v2390_v33 = vsel %vm774_vm3, %v3727_v57, 0 }
 0x89f   : > { %v4524_v60 = vpop.eup %4523 }
 0x8a0   : > { %v1993_v0 = vmul.f32 %v4524_v60, %v4520_v23  ;;  %v4446_v60 = vld [vmem:[%s5599_s1 + $0x420] sm:$0xff]  }
 0x8a1   : > { %4056 = vmatprep.subr.bf16.mxu0 %v4446_v60  ;;  %v4461_v60 = vld [vmem:[%s5599_s1 + $0x4d8] sm:$0xff]  }
 0x8a2   : > { %4057 = vmatpush3.bf16.msra.mxu0 %v4447_v38  ;;  %v4462_v38 = vld [vmem:[%s5599_s1 + $0x498] sm:$0xff]  }
 0x8a3   : > { %v4526_v27 = vpop.eup %4525 }
 0x8a4   : > { %v1994_v34 = vmul.f32 %v4526_v27, %v4522_v25  ;;  %v4448_v27 = vld [vmem:[%s5599_s1 + $0x418] sm:$0xff]  }
 0x8a5   : > { %4058 = vmatprep.subr.bf16.mxu0 %v4448_v27  ;;  %v4463_v27 = vld [vmem:[%s5599_s1 + $0x4d0] sm:$0xff]  }
 0x8a6   : > { %v1995_v3 = vpack.c.bf16 %v1994_v34, %v1993_v0  ;;  %v4449_v0 = vld [vmem:[%s5599_s1 + $0x3d8] sm:$0xff]   ;;  %v4451_v34 = vld [vmem:[%s5599_s1 + $0x410] sm:$0xff]  }
 0x8a7   : > { %4059 = vmatpush3.bf16.msra.mxu0 %v4449_v0  ;;  %v4464_v0 = vld [vmem:[%s5599_s1 + $0x490] sm:$0xff]  }
 0x8a8   : > { %3662 = vmatmul.mubr.msk.bf16.vlgmr.msra.gmra.mxu1 %vm468_vm2, %v1995_v3  ;;  %4060 = vmatprep.subr.bf16.mxu0 %v4451_v34  ;;  %v4465_v34 = vld [vmem:[%s5599_s1 + $0x4c8] sm:$0xff]  }
 0x8a9   : > { %4193 = vmatpush3.bf16.msra.mxu1 %v2017_v44  ;;  %4194 = vmatprep.mubr.msk.bf16.mxu1 %vm4618_vm0, %v4617_v1  ;;  %v4453_v44 = vld [vmem:[%s5599_s1 + $0x408] sm:$0xff]  }
 0x8aa   : > { %4198 = vmatprep.subr.bf16.mxu1 %v4617_v1 }
 0x8b0   : > { %4195 = vmatmul.mubr.msk.bf16.vlgmr.msra.gmra.mxu1 %vm468_vm2, %v1995_v3  ;;  %v4452_v3 = vld [vmem:[%s5599_s1 + $0x3d0] sm:$0xff]  }
 0x8b1   : > { %4199 = vmatpush3.bf16.msra.mxu1 %v4432_v46  ;;  %4206 = vmatprep.mubr.msk.bf16.mxu1 %vm4618_vm0, %v4617_v1  ;;  %v4454_v46 = vld [vmem:[%s5599_s1 + $0x3c8] sm:$0xff]  }
 0x8b2   : > { %4200 = vmatprep.subr.bf16.mxu1 %v4617_v1  ;;  %4061 = vmatpush3.bf16.msra.mxu0 %v4452_v3  ;;  %v3794_v3 = vld [vmem:[%s5600_s2 + $0x48] sm:$0xff] }
 0x8b3   : > { %4062 = vmatprep.subr.bf16.mxu0 %v4453_v44  ;;  %v3797_v44 = vcombine.high %v3794_v3, %v3794_v3 }
 0x8b5   : > { %4201 = vmatpush3.bf16.msra.mxu1 %v4435_v5  ;;  %v4456_v5 = vld [vmem:[%s5599_s1 + $0x400] sm:$0xff]  }
 0x8b6   : > { %4202 = vmatprep.subr.bf16.mxu1 %v4617_v1  ;;  %4063 = vmatpush3.bf16.msra.mxu0 %v4454_v46  ;;  %v3796_v46 = vcombine.low %v3794_v3, %v3794_v3 }
 0x8b7   : > { %4064 = vmatprep.subr.bf16.mxu0 %v4456_v5  ;;  %v4466_v5 = vld [vmem:[%s5599_s1 + $0x488] sm:$0xff]  }
 0x8b9   : > { %4203 = vmatpush3.bf16.msra.mxu1 %v4436_v6  ;;  %v4457_v6 = vld [vmem:[%s5599_s1 + $0x3c0] sm:$0xff]  }
 0x8ba   : > { %4204 = vmatprep.subr.bf16.mxu1 %v4617_v1  ;;  %4065 = vmatpush3.bf16.msra.mxu0 %v4457_v6  ;;  %v2769_v6 = vsel %vm774_vm3, %v3796_v46, 0 }
 0x8bb   : > { %4079 = vmatprep.subr.bf16.mxu0 %v4461_v60 }
 0x8bd   : > { %4205 = vmatpush3.bf16.msra.mxu1 %v4437_v7  ;;  %2682 = vmatmul.mubr.bf16.vlgmr.msra.gmra.mxu0 %v5035_v21 }
 0x8be   : > { %3730 = vmatprep.subr.msk.bf16.mxu1 %vm774_vm3, %v3728_v56  ;;  %3060 = vmatprep.mubr.bf16.mxu0 %v5039_v22  ;;  %v4455_v22 = vld [vmem:[%s5599_s1 + $0x458] sm:$0xff]  }
 0x8bf   : > { %4080 = vmatpush3.bf16.msra.mxu0 %v4462_v38 }
 0x8c0   : > { %4207 = vmatmul.mubr.msk.bf16.vlgmr.msra.gmra.mxu1 %vm382_vm1, %v4942_v10  ;;  %4081 = vmatprep.subr.bf16.mxu0 %v4463_v27 }
 0x8c1   : > { %2430 = vmatprep.mubr.bf16.mxu1 %v4619_v36  ;;  %2413 = vmatpush1.bf16.msra.mxu1 %v2390_v33 }
 0x8c2   : > { %4210 = vmatprep.subr.bf16.mxu1 %v4617_v1 }
 0x8c3   : > { %4082 = vmatpush3.bf16.msra.mxu0 %v4464_v0 }
 0x8c4   : > { %4083 = vmatprep.subr.bf16.mxu0 %v4465_v34 }
 0x8c7   : > { %4084 = vmatpush3.bf16.msra.mxu0 %v4466_v5 }
 0x968   : > { %v2053_v48 = vpop.f32.mrf.mxu1 }
 0x969   : > { %v5286_v8 = vadd.f32 %v2053_v48, %v5179_v59  ;;  %v4037_v59 = vpop.f32.mrf.mxu0 }
 0x96a   : > { %v2055_v9 = vpop.f32.mrf.mxu1 }
 0x96b   : > { %v5289_v11 = vadd.f32 %v2055_v9, %v5182_v61  ;;  %v4038_v18 = vpop.f32.mrf.mxu0 }
 0x96c   : > { %v2057_v50 = vpop.f32.mrf.mxu1  ;;  %v4039_v20 = vadd.f32 %v4038_v18, %v4037_v59  ;;  %v4459_v18 = vld [vmem:[%s5599_s1 + $0x448] sm:$0xff]  }
 0x96d   : > { %v5292_v12 = vadd.f32 %v2057_v50, %v5185_v62  ;;  %v4040_v19 = vpop.f32.mrf.mxu0  ;;  %v4450_v50 = vld [vmem:[%s5600_s2 + $0x44] ss:$0 sps:$4 sm:$0xff]  }
 0x96e   : > { %v2059_v52 = vpop.f32.mrf.mxu1  ;;  %v2396_v59 = vsel %vm774_vm3, %v4450_v50, 0  ;;  %v4472_v50 = vld [vmem:[%s5599_s1 + $0x478] sm:$0xff]  }
 0x96f   : > { %v5295_v13 = vadd.f32 %v2059_v52, %v5188_v63  ;;  %v4041_v62 = vpop.f32.mrf.mxu0 }
 0x970   : > { %v2096_v14 = vpop.f32.mrf.mxu1  ;;  %v4042_v63 = vadd.f32 %v4041_v62, %v4040_v19  ;;  %v4460_v19 = vld [vmem:[%s5599_s1 + $0x440] sm:$0xff]  }
 0x971   : > { %v5298_v15 = vadd.f32 %v2096_v14, %v5191_v2 }
 0x972   : > { %v4196_v55 = vpop.f32.mrf.mxu1 }
 0x974   : > { %v2099_v16 = vpop.f32.mrf.mxu1 }
 0x975   : > { %v5301_v17 = vadd.f32 %v2099_v16, %v5194_v4 }
 0x976   : > { %v4197_v61 = vpop.f32.mrf.mxu1 }
 0x977   : > { %v4458_v61 = vld [vmem:[%s5599_s1 + $0x450] sm:$0xff]  }
 0x980   : > { %v2345_v23 = vpop.f32.mrf.mxu1 }
 0x981   : > { %v2346_v24 = vadd.f32 %v4039_v20, %v2345_v23 }
 0x982   : > { %v4208_v25 = vpop.f32.mrf.mxu1 }
 0x983   : > { %v2352_v28 = vsel %vm468_vm2, %v2346_v24, -inf }
 0x984   : > { %2353 = vmax.xlane.f32.xlu0 %v2352_v28  ;;  %v2348_v2 = vpop.f32.mrf.mxu1 }
 0x985   : > { %v2349_v29 = vadd.f32 %v4042_v63, %v2348_v2 }
 0x986   : > { %v4209_v32 = vpop.f32.mrf.mxu1 }
 0x987   : > { %v2355_v30 = vsel %vm468_vm2, %v2349_v29, -inf }
 0x988   : > { %2356 = vmax.xlane.f32.xlu1 %v2355_v30 }
 0xa0d   : > { %v2354_v4 = vpop.xlane.xlu0 %2353 }
 0xa0e   : > { %v2358_v35 = vsub.f32 %v2346_v24, %v2354_v4 }
 0xa10   : > { %v2360_v37 = vmul.f32 1.442695, %v2358_v35 }
 0xa11   : > { %v2357_v39 = vpop.xlane.xlu1 %2356 }
 0xa12   : > { %4527 = vpow2.f32 %v2360_v37  ;;  %v2359_v40 = vsub.f32 %v2349_v29, %v2357_v39 }
 0xa14   : > { %v2362_v41 = vmul.f32 1.442695, %v2359_v40 }
 0xa16   : > { %4529 = vpow2.f32 %v2362_v41 }
 0xa1f   : > { %v4528_v42 = vpop.eup %4527 }
 0xa20   : > { %v2364_v43 = vsel %vm468_vm2, %v4528_v42, 0.0 }
 0xa21   : > { %2365 = vadd.xlane.f32.xlu0 %v2364_v43 }
 0xa23   : > { %v4530_v45 = vpop.eup %4529 }
 0xa24   : > { %v2367_v47 = vsel %vm468_vm2, %v4530_v45, 0.0 }
 0xa25   : > { %2368 = vadd.xlane.f32.xlu1 %v2367_v47 }
 0xaaa   : > { %v2366_v7 = vpop.xlane.xlu0 %2365 }
 0xaab   : > { %4531 = vrcp.f32 %v2366_v7  ;;  %v4469_v7 = vld [vmem:[%s5599_s1 + $0x4c0] sm:$0xff]  }
 0xaac   : > { %4085 = vmatprep.subr.bf16.mxu0 %v4469_v7 }
 0xaae   : > { %v2369_v48 = vpop.xlane.xlu1 %2368 }
 0xaaf   : > { %4533 = vrcp.f32 %v2369_v48  ;;  %v4470_v48 = vld [vmem:[%s5599_s1 + $0x480] sm:$0xff]  }
 0xab0   : > { %4086 = vmatpush3.bf16.msra.mxu0 %v4470_v48 }
 0xab8   : > { %v4532_v9 = vpop.eup %4531 }
 0xab9   : > { %v2372_v14 = vmul.f32 %v4532_v9, %v4528_v42  ;;  %v4471_v9 = vld [vmem:[%s5599_s1 + $0x4b8] sm:$0xff]  }
 0xaba   : > { %4087 = vmatprep.subr.bf16.mxu0 %v4471_v9 }
 0xabb   : > { %4088 = vmatpush3.bf16.msra.mxu0 %v4472_v50 }
 0xabc   : > { %v4534_v52 = vpop.eup %4533 }
 0xabd   : > { %v2373_v55 = vmul.f32 %v4534_v52, %v4530_v45  ;;  %v4474_v52 = vld [vmem:[%s5599_s1 + $0x4b0] sm:$0xff]  }
 0xabe   : > { %4089 = vmatprep.subr.bf16.mxu0 %v4474_v52 }
 0xabf   : > { %v2374_v16 = vpack.c.bf16 %v2373_v55, %v2372_v14  ;;  %v4475_v14 = vld [vmem:[%s5599_s1 + $0x470] sm:$0xff]   ;;  %v4476_v55 = vld [vmem:[%s5599_s1 + $0x4a8] sm:$0xff]  }
 0xac0   : > { %4090 = vmatpush3.bf16.msra.mxu0 %v4475_v14 }
 0xac1   : > { %3731 = vmatmul.mubr.msk.bf16.vlgmr.msra.gmra.mxu1 %vm468_vm2, %v2374_v16  ;;  %4091 = vmatprep.subr.bf16.mxu0 %v4476_v55  ;;  %v4486_v55 = vld [vmem:[%s5600_s2 + $0x5c] ss:$0 sps:$4 sm:$0xff]  }
 0xac2   : > { %4211 = vmatpush3.bf16.msra.mxu1 %v2396_v59  ;;  %4212 = vmatprep.mubr.msk.bf16.mxu1 %vm4618_vm0, %v4617_v1  ;;  %v4479_v59 = vld [vmem:[%s5599_s1 + $0x4a0] sm:$0xff]  }
 0xac3   : > { %4216 = vmatprep.subr.bf16.mxu1 %v4617_v1 }
 0xac9   : > { %4213 = vmatmul.mubr.msk.bf16.vlgmr.msra.gmra.mxu1 %vm468_vm2, %v2374_v16  ;;  %v4477_v16 = vld [vmem:[%s5599_s1 + $0x468] sm:$0xff]  }
 0xaca   : > { %4217 = vmatpush3.bf16.msra.mxu1 %v4455_v22  ;;  %4224 = vmatprep.mubr.msk.bf16.mxu1 %vm4618_vm0, %v4617_v1  ;;  %v4480_v22 = vld [vmem:[%s5599_s1 + $0x460] sm:$0xff]  }
 0xacb   : > { %4218 = vmatprep.subr.bf16.mxu1 %v4617_v1  ;;  %4092 = vmatpush3.bf16.msra.mxu0 %v4477_v16 }
 0xacc   : > { %4093 = vmatprep.subr.bf16.mxu0 %v4479_v59 }
 0xace   : > { %4219 = vmatpush3.bf16.msra.mxu1 %v4458_v61 }
 0xacf   : > { %4220 = vmatprep.subr.bf16.mxu1 %v4617_v1  ;;  %4094 = vmatpush3.bf16.msra.mxu0 %v4480_v22 }
 0xad2   : > { %4221 = vmatpush3.bf16.msra.mxu1 %v4459_v18  ;;  %3061 = vmatmul.mubr.bf16.vlgmr.msra.gmra.mxu0 %v5035_v21  ;;  %v4478_v21 = vld [vmem:[%s5599_s1 + $0x4f8] sm:$0xff]  }
 0xad3   : > { %4222 = vmatprep.subr.bf16.mxu1 %v4617_v1 }
 0xad6   : > { %4223 = vmatpush3.bf16.msra.mxu1 %v4460_v19 }
 0xad7   : > { %3799 = vmatprep.subr.msk.bf16.mxu1 %vm774_vm3, %v3797_v44 }
 0xad9   : > { %4225 = vmatmul.mubr.msk.bf16.vlgmr.msra.gmra.mxu1 %vm382_vm1, %v4942_v10 }
 0xada   : > { %2809 = vmatprep.mubr.bf16.mxu1 %v4619_v36  ;;  %2792 = vmatpush1.bf16.msra.mxu1 %v2769_v6  ;;  %v3863_v6 = vld [vmem:[%s5600_s2 + $0x54] sm:$0xff] }
 0xadb   : > { %4228 = vmatprep.subr.bf16.mxu1 %v4617_v1  ;;  %v3866_v7 = vcombine.high %v3863_v6, %v3863_v6  ;;  %v3865_v48 = vcombine.low %v3863_v6, %v3863_v6 }
 0xadd   : > { %v3148_v9 = vsel %vm774_vm3, %v3865_v48, 0 }
 0xb81   : > { %v2432_v20 = vpop.f32.mrf.mxu1 }
 0xb82   : > { %v5393_v62 = vadd.f32 %v2432_v20, %v5286_v8  ;;  %v4066_v8 = vpop.f32.mrf.mxu0  ;;  %v4473_v20 = vld [vmem:[%s5600_s2 + $0x50] ss:$0 sps:$4 sm:$0xff]  }
 0xb83   : > { %v2434_v23 = vpop.f32.mrf.mxu1 }
 0xb84   : > { %v5396_v24 = vadd.f32 %v2434_v23, %v5289_v11  ;;  %v4067_v35 = vpop.f32.mrf.mxu0 }
 0xb85   : > { %v2436_v25 = vpop.f32.mrf.mxu1  ;;  %v4068_v39 = vadd.f32 %v4067_v35, %v4066_v8  ;;  %v4482_v8 = vld [vmem:[%s5599_s1 + $0x4e8] sm:$0xff]  }
 0xb86   : > { %v5399_v63 = vadd.f32 %v2436_v25, %v5292_v12  ;;  %v4069_v37 = vpop.f32.mrf.mxu0  ;;  %v4554_v35 = vld [vmem:[%s4735_s9 + $0x8] ss:$12 sps:$4 sm:$0xff]   ;;  %s4561_s9 = scalar_lea.vmem %s4560_s22, 1536 }
 0xb87   : > { %v2438_v28 = vpop.f32.mrf.mxu1  ;;  %p4563_p1 = scmp.lt.s32.totalorder %s4561_s9, %s4555_s14 }
 0xb88   : > { %v5402_v2 = vadd.f32 %v2438_v28, %v5295_v13  ;;  %v4070_v12 = vpop.f32.mrf.mxu0 }
 0xb89   : > { %v2475_v29 = vpop.f32.mrf.mxu1  ;;  %v4071_v13 = vadd.f32 %v4070_v12, %v4069_v37  ;;  %p4564_p2 = por %p4563_p1, %p4562_p0 }
 0xb8a   : > { %v5405_v10 = vadd.f32 %v2475_v29, %v5298_v15 }
 0xb8b   : > { %v4214_v32 = vpop.f32.mrf.mxu1  ;;  %p4565_p3 = pnand %p4564_p2, %p4558_p13 }
 0xb8c   : > { %v2775_v32 = vsel %vm774_vm3, %v4473_v20, 0 }
 0xb8d   : > { %v2478_v30 = vpop.f32.mrf.mxu1 }
 0xb8e   : > { %v5408_v4 = vadd.f32 %v2478_v30, %v5301_v17  ;;  %v4481_v30 = vld [vmem:[%s5599_s1 + $0x4f0] sm:$0xff]  }
 0xb8f   : > { %v4215_v11 = vpop.f32.mrf.mxu1 }
 0xb90   : > { %v4483_v11 = vld [vmem:[%s5599_s1 + $0x4e0] sm:$0xff]  }
 0xb99   : > { %v2724_v40 = vpop.f32.mrf.mxu1 }
 0xb9a   : > { %v2725_v41 = vadd.f32 %v4068_v39, %v2724_v40 }
 0xb9b   : > { %v4226_v42 = vpop.f32.mrf.mxu1 }
 0xb9c   : > { %v2731_v43 = vsel %vm468_vm2, %v2725_v41, -inf }
 0xb9d   : > { %2732 = vmax.xlane.f32.xlu0 %v2731_v43  ;;  %v2727_v15 = vpop.f32.mrf.mxu1 }
 0xb9e   : > { %v2728_v45 = vadd.f32 %v4071_v13, %v2727_v15 }
 0xb9f   : > { %v4227_v47 = vpop.f32.mrf.mxu1 }
 0xba0   : > { %v2734_v49 = vsel %vm468_vm2, %v2728_v45, -inf }
 0xba1   : > { %2735 = vmax.xlane.f32.xlu1 %v2734_v49 }
 0xc26   : > { %v2733_v17 = vpop.xlane.xlu0 %2732 }
 0xc27   : > { %v2737_v51 = vsub.f32 %v2725_v41, %v2733_v17 }
 0xc29   : > { %v2739_v53 = vmul.f32 1.442695, %v2737_v51 }
 0xc2a   : > { %v2736_v54 = vpop.xlane.xlu1 %2735 }
 0xc2b   : > { %4535 = vpow2.f32 %v2739_v53  ;;  %v2738_v26 = vsub.f32 %v2728_v45, %v2736_v54 }
 0xc2d   : > { %v2741_v31 = vmul.f32 1.442695, %v2738_v26 }
 0xc2f   : > { %4537 = vpow2.f32 %v2741_v31 }
 0xc38   : > { %v4536_v56 = vpop.eup %4535 }
 0xc39   : > { %v2743_v57 = vsel %vm468_vm2, %v4536_v56, 0.0 }
 0xc3a   : > { %2744 = vadd.xlane.f32.xlu0 %v2743_v57 }
 0xc3c   : > { %v4538_v58 = vpop.eup %4537 }
 0xc3d   : > { %v2746_v33 = vsel %vm468_vm2, %v4538_v58, 0.0 }
 0xc3e   : > { %2747 = vadd.xlane.f32.xlu1 %v2746_v33 }
 0xcc3   : > { %v2745_v61 = vpop.xlane.xlu0 %2744 }
 0xcc4   : > { %4539 = vrcp.f32 %v2745_v61 }
 0xcc7   : > { %v2748_v18 = vpop.xlane.xlu1 %2747 }
 0xcc8   : > { %4541 = vrcp.f32 %v2748_v18  ;;  %v3154_v18 = vsel %vm774_vm3, %v4486_v55, 0 }
 0xcd1   : > { %v4540_v19 = vpop.eup %4539 }
 0xcd2   : > { %v2751_v25 = vmul.f32 %v4540_v19, %v4536_v56  ;;  %v3248_v19 = vlaneseq }
 0xcd4   : > { %v3249_v20 = vshrl.u32 %v3248_v19, 7 }
 0xcd5   : > { %v4542_v23 = vpop.eup %4541 }
 0xcd6   : > { %v2752_v28 = vmul.f32 %v4542_v23, %v4538_v58  ;;  %v3250_v23 = vsub.s32 0, %v3249_v20 }
 0xcd8   : > { %v2753_v29 = vpack.c.bf16 %v2752_v28, %v2751_v25  ;;  %v3246_v25 = vld [vmem:[%s5601_s3] sm:$0x7]  ;;  %v3254_v28 = vsub.s32 1, %v3249_v20 }
 0xcda   : > { %3800 = vmatmul.mubr.msk.bf16.vlgmr.msra.gmra.mxu1 %vm468_vm2, %v2753_v29 }
 0xcdb   : > { %4229 = vmatpush3.bf16.msra.mxu1 %v2775_v32  ;;  %4230 = vmatprep.mubr.msk.bf16.mxu1 %vm4618_vm0, %v4617_v1 }
 0xcdc   : > { %4234 = vmatprep.subr.bf16.mxu1 %v4617_v1 }
 0xce2   : > { %4231 = vmatmul.mubr.msk.bf16.vlgmr.msra.gmra.mxu1 %vm468_vm2, %v2753_v29  ;;  %v3251_v29 = vrot.slane %v3246_v25, %v3250_v23 }
 0xce3   : > { %4235 = vmatpush3.bf16.msra.mxu1 %v4478_v21  ;;  %4242 = vmatprep.mubr.msk.bf16.mxu1 %vm4618_vm0, %v4617_v1 }
 0xce4   : > { %4236 = vmatprep.subr.bf16.mxu1 %v4617_v1 }
 0xce7   : > { %4237 = vmatpush3.bf16.msra.mxu1 %v4481_v30  ;;  %v3255_v30 = vrot.slane %v3246_v25, %v3254_v28 }
 0xce8   : > { %4238 = vmatprep.subr.bf16.mxu1 %v4617_v1 }
 0xceb   : > { %4239 = vmatpush3.bf16.msra.mxu1 %v4482_v8 }
 0xcec   : > { %4240 = vmatprep.subr.bf16.mxu1 %v4617_v1 }
 0xcef   : > { %4241 = vmatpush3.bf16.msra.mxu1 %v4483_v11 }
 0xcf0   : > { %3868 = vmatprep.subr.msk.bf16.mxu1 %vm774_vm3, %v3866_v7 }
 0xcf2   : > { %4243 = vmatmul.mubr.msk.bf16.vlgmr.msra.gmra.mxu1 %vm382_vm1, %v4554_v35  ;;  %v3258_v35 = vsub.s32 2, %v3249_v20 }
 0xcf3   : > { %3188 = vmatprep.mubr.bf16.mxu1 %v4619_v36  ;;  %3171 = vmatpush1.bf16.msra.mxu1 %v3148_v9 }
 0xcf4   : > { %4246 = vmatprep.subr.bf16.mxu1 %v4617_v1 }
 0xd9a   : > { %v2811_v37 = vpop.f32.mrf.mxu1 }
 0xd9b   : > { %v5499_v39 = vadd.f32 %v2811_v37, %v5393_v62  ;;  %v4095_v62 = vpop.f32.mrf.mxu0 }
 0xd9c   : > { %v2813_v12 = vpop.f32.mrf.mxu1 }
 0xd9d   : > { %v5502_v40 = vadd.f32 %v2813_v12, %v5396_v24  ;;  %v4096_v17 = vpop.f32.mrf.mxu0 }
 0xd9e   : > { %v2815_v41 = vpop.f32.mrf.mxu1  ;;  %v4097_v53 = vadd.f32 %v4096_v17, %v4095_v62 }
 0xd9f   : > { %v5505_v42 = vadd.f32 %v2815_v41, %v5399_v63  ;;  %v4098_v51 = vpop.f32.mrf.mxu0 }
 0xda0   : > { %v2817_v13 = vpop.f32.mrf.mxu1 }
 0xda1   : > { %v5508_v43 = vadd.f32 %v2817_v13, %v5402_v2  ;;  %v4099_v63 = vpop.f32.mrf.mxu0 }
 0xda2   : > { %v2854_v15 = vpop.f32.mrf.mxu1  ;;  %v4100_v2 = vadd.f32 %v4099_v63, %v4098_v51 }
 0xda3   : > { %v5511_v45 = vadd.f32 %v2854_v15, %v5405_v10 }
 0xda4   : > { %v4232_v36 = vpop.f32.mrf.mxu1 }
 0xda6   : > { %v2857_v47 = vpop.f32.mrf.mxu1 }
 0xda7   : > { %v5514_v49 = vadd.f32 %v2857_v47, %v5408_v4  ;;  %v3259_v47 = vrot.slane %v3246_v25, %v3258_v35 }
 0xda8   : > { %v4233_v24 = vpop.f32.mrf.mxu1 }
 0xdb2   : > { %v3103_v54 = vpop.f32.mrf.mxu1 }
 0xdb3   : > { %v3104_v26 = vadd.f32 %v4097_v53, %v3103_v54 }
 0xdb4   : > { %v4244_v31 = vpop.f32.mrf.mxu1 }
 0xdb5   : > { %v3110_v56 = vsel %vm468_vm2, %v3104_v26, -inf }
 0xdb6   : > { %3111 = vmax.xlane.f32.xlu0 %v3110_v56  ;;  %v3106_v10 = vpop.f32.mrf.mxu1 }
 0xdb7   : > { %v3107_v57 = vadd.f32 %v4100_v2, %v3106_v10 }
 0xdb8   : > { %v4245_v58 = vpop.f32.mrf.mxu1 }
 0xdb9   : > { %v3113_v33 = vsel %vm468_vm2, %v3107_v57, -inf }
 0xdba   : > { %3114 = vmax.xlane.f32.xlu1 %v3113_v33 }
 0xe3f   : > { %v3112_v4 = vpop.xlane.xlu0 %3111 }
 0xe40   : > { %v3116_v60 = vsub.f32 %v3104_v26, %v3112_v4 }
 0xe42   : > { %v3118_v38 = vmul.f32 1.442695, %v3116_v60 }
 0xe43   : > { %v3115_v27 = vpop.xlane.xlu1 %3114 }
 0xe44   : > { %4543 = vpow2.f32 %v3118_v38  ;;  %v3117_v0 = vsub.f32 %v3107_v57, %v3115_v27 }
 0xe46   : > { %v3120_v34 = vmul.f32 1.442695, %v3117_v0 }
 0xe48   : > { %4545 = vpow2.f32 %v3120_v34 }
 0xe51   : > { %v4544_v3 = vpop.eup %4543 }
 0xe52   : > { %v3122_v44 = vsel %vm468_vm2, %v4544_v3, 0.0 }
 0xe53   : > { %3123 = vadd.xlane.f32.xlu0 %v3122_v44 }
 0xe55   : > { %v4546_v46 = vpop.eup %4545 }
 0xe56   : > { %v3125_v5 = vsel %vm468_vm2, %v4546_v46, 0.0 }
 0xe57   : > { %3126 = vadd.xlane.f32.xlu1 %v3125_v5 }
 0xedc   : > { %v3124_v50 = vpop.xlane.xlu0 %3123 }
 0xedd   : > { %4547 = vrcp.f32 %v3124_v50 }
 0xee0   : > { %v3127_v52 = vpop.xlane.xlu1 %3126 }
 0xee1   : > { %4549 = vrcp.f32 %v3127_v52 }
 0xeea   : > { %v4548_v14 = vpop.eup %4547 }
 0xeeb   : > { %v3130_v59 = vmul.f32 %v4548_v14, %v4544_v3 }
 0xeee   : > { %v4550_v16 = vpop.eup %4549 }
 0xeef   : > { %v3131_v22 = vmul.f32 %v4550_v16, %v4546_v46 }
 0xef1   : > { %v3132_v61 = vpack.c.bf16 %v3131_v22, %v3130_v59 }
 0xef3   : > { %3869 = vmatmul.mubr.msk.bf16.vlgmr.msra.gmra.mxu1 %vm468_vm2, %v3132_v61 }
 0xef4   : > { %4247 = vmatpush3.bf16.msra.mxu1 %v3154_v18  ;;  %4248 = vmatprep.mubr.msk.bf16.mxu1 %vm4618_vm0, %v4617_v1 }
 0xefb   : > { %4249 = vmatmul.mubr.msk.bf16.vlgmr.msra.gmra.mxu1 %vm468_vm2, %v3132_v61 }
 0xfb3   : > { %v3190_v32 = vpop.f32.mrf.mxu1 }
 0xfb4   : > { %v3240_v21 = vadd.f32 %v3190_v32, %v5499_v39 }
 0xfb5   : > { %v3192_v8 = vpop.f32.mrf.mxu1 }
 0xfb6   : > { %v3263_v1 = vadd.f32 %v3251_v29, %v3240_v21  ;;  %v3241_v11 = vadd.f32 %v3192_v8, %v5502_v40 }
 0xfb7   : > { %v3194_v37 = vpop.f32.mrf.mxu1 }
 0xfb8   : > { %3269 = vst [vmem:[%s193_s8] sm:$0xff] %v3263_v1  ;;  %v3264_v12 = vadd.f32 %v3255_v30, %v3241_v11  ;;  %v3243_v41 = vadd.f32 %v3194_v37, %v5505_v42 }
 0xfb9   : > { %v3196_v13 = vpop.f32.mrf.mxu1 }
 0xfba   : > { %3270 = vst [vmem:[%s193_s8 + $0x8] sm:$0xff] %v3264_v12  ;;  %v3266_v15 = vadd.f32 %v3251_v29, %v3243_v41  ;;  %v3244_v36 = vadd.f32 %v3196_v13, %v5508_v43 }
 0xfbb   : > { %v3233_v39 = vpop.f32.mrf.mxu1 }
 0xfbc   : > { %3272 = vst [vmem:[%s193_s8 + $0x18] sm:$0xff] %v3266_v15  ;;  %v3267_v62 = vadd.f32 %v3255_v30, %v3244_v36  ;;  %v3242_v40 = vadd.f32 %v3233_v39, %v5511_v45 }
 0xfbd   : > { %v4250_v24 = vpop.f32.mrf.mxu1 }
 0xfbe   : > { %3273 = vst [vmem:[%s193_s8 + $0x20] sm:$0xff] %v3267_v62  ;;  %v3265_v17 = vadd.f32 %v3259_v47, %v3242_v40 }
 0xfbf   : > { %v3236_v51 = vpop.f32.mrf.mxu1 }
 0xfc0   : > { %3271 = vst.msk [vmem:[%s193_s8 + $0x10] sm:$0xff] %vm382_vm1, %v3265_v17  ;;  %v3245_v42 = vadd.f32 %v3236_v51, %v5514_v49 }
 0xfc1   : > { %v4251_v43 = vpop.f32.mrf.mxu1 }
 0xfc2   : > { %v3268_v45 = vadd.f32 %v3259_v47, %v3245_v42 }
 0xfc4   : > { %3274 = vst.msk [vmem:[%s193_s8 + $0x28] sm:$0xff] %vm382_vm1, %v3268_v45 }
 0xfc5   : > { %4568 = shalt.err (!%p4565_p3)
}
 0xfc6   : > { %s4569_s23 = scalar_lea.hbm %s5553_s13, 768  ;;  %s4573_s29 = scalar_lea.hbm %s5602_s4, 1536 }
 0xfc7   : > { %p4570_p4 = scmp.ne.s32.totalorder %s5553_s13, %s4569_s23  ;;  %p4574_p9 = scmp.lt.s32.totalorder %s5553_s13, %s5602_s4 }
 0xfc8   : > { %p4575_p10 = scmp.lt.s32.totalorder %s4573_s29, %s4569_s23 }
 0xfc9   : > { %p4571_p7 = pnand %p4570_p4, %p4686_p5 }
 0xfca   : > { %p4576_p11 = por %p4575_p10, %p4574_p9 }
 0xfcb   : > { %p4572_p8 = pneg %p4571_p7 }
 0xfcd   : > { %p4577_p12 = pnand %p4576_p11, %p4572_p8 }
 0xfcf   : > { %4580 = shalt.err (!%p4577_p12)
}
 0xfd0   : > { %s4621_s6 = smov 384   ;;  %s4622_s8 = smov 24  }
 0xfd1   : > { %4255 = dma.vmem_to_hbm [thread:$0]  (%p4686_p5), %s5548_s11, 768, %s5553_s13, %s5558_s19, %s4621_s6, %s4621_s6, %s4622_s8  }
 0xfd2 PF: > { %p4261_p13 = scmp.ge.s32.totalorder %s4615_s18, 2  ;;  %s3305_s10 = sand.u32 1, %s4603_s15  }
 0xfd3   : > { %s3306_s7 = scalar_lea.sflag [#allocation3], %s3305_s10 }
 0xfd4   : > { %p4258_p0 = pnand %p4261_p13, %p4690_p6 }
 0xfd6   : > { %p4259_p1 = pneg %p4258_p0 }
 0xfd8   : > { %4598 = dma.done.wait (%p4259_p1), %s3306_s7, 768  }
 0xfd9   : > { %4600 = vsyncadd (%p4259_p1), %s3306_s7, 4294966528  ;;  %p14_p2 = scmp.ge.s32.totalorder %s4673_s21, 4   ;;  %s5605_s15 = smov %s4607_s16 }
 0xfda   : > { %s5606_s16 = smov %s4611_s17  ;;  %s5607_s17 = smov %s4684_s24 }
 0xfdb   : > { %s5608_s18 = smov %s4673_s21  ;;  %16 = sbr.rel (!%p14_p2) target bundleno = 3 (0x3), region = 85 }
 0xfe0   :  { %3311 = vsyncpa [#allocation3], 1 }
 0xfe1   :  { %3313 = vsyncpa [#allocation3 + $0x1], 1 }

</bundles_post_ra>
